<compile_context>
chip_gen: v7x
topology: tpu7x:2x2x1
jax: 0.10.0
libtpu: 0.0.40
codegen_flags: <defaults>
</compile_context>

<pallas_src>
import jax
import jax.numpy as jnp
from jax import lax
from jax.experimental import pallas as pl
from jax.experimental.pallas import tpu as pltpu

EPS = 1e-5
MAX_TILE_M = 16384                     # absolute row-tile cap
TILE_BYTES_TARGET = 6 * 1024 * 1024    # ~bf16 A+O bytes moved per grid step
VMEM_LIMIT_BYTES = 48 * 1024 * 1024    # > v5e/v6e scoped defaults, < v7x physical

# (cin, cout, kernel, stride, pad, has_batchnorm+relu)
LAYER_CFG = [
    (64, 256, 2, 1, 0, True),   # (N,64,1,1)   -> (N,256,2,2)
    (256, 128, 4, 2, 1, True),  # (N,256,2,2)  -> (N,128,4,4)
    (128, 64, 3, 2, 1, True),   # (N,128,4,4)  -> (N,64,7,7)
    (64, 32, 4, 2, 1, True),    # (N,64,7,7)   -> (N,32,14,14)
    (32, 1, 4, 2, 1, False),    # (N,32,14,14) -> (N,1,28,28)  + tanh
]


def _round_up(x, mult):
    return pl.cdiv(x, mult) * mult


# ---------------------------------------------------------------------------
# Pallas kernels: [optional fused folded-BN + ReLU in f32] -> bf16 MXU matmul
# with f32 accumulation -> bf16 store (halves HBM writeback).
# ---------------------------------------------------------------------------
def _bn_relu_matmul_kernel(a_ref, scale_ref, shift_ref, w_ref, o_ref):
    # a: (tm, Cin) bf16 pre-BN activation of the previous layer.
    # scale/shift: (1, Cin) f32 folded BN (gamma*rsqrt(var+eps), beta - mean*scale).
    a = a_ref[...].astype(jnp.float32)                    # f32 VPU math (v5e-safe)
    a = jnp.maximum(a * scale_ref[...] + shift_ref[...], 0.0)
    o_ref[...] = jnp.dot(a.astype(jnp.bfloat16), w_ref[...],
                         preferred_element_type=jnp.float32).astype(jnp.bfloat16)


def _matmul_kernel(a_ref, w_ref, o_ref):
    o_ref[...] = jnp.dot(a_ref[...], w_ref[...],
                         preferred_element_type=jnp.float32).astype(jnp.bfloat16)


def _choose_tiles(m, kdim, cols):
    """Per-layer tiling.

    Row tiles sized for ~TILE_BYTES_TARGET of bf16 A+O traffic per grid step
    (large tiles amortize the ~0.35 us/step overhead and reach the HBM roofline),
    then balanced so row padding stays small.  When the grid would be (1, 1) the
    columns (lane-aligned halves) or rows are split so both v7x TensorCores get
    work; this is a no-op for v5e/v6e correctness.
    """
    cap = (TILE_BYTES_TARGET // (2 * (kdim + cols))) // 8 * 8
    cap = max(8, min(MAX_TILE_M, cap))
    grid_m = max(1, pl.cdiv(m, cap))
    tm = _round_up(pl.cdiv(m, grid_m), 8)
    m_pad = _round_up(m, tm)
    grid_m = m_pad // tm

    tc, grid_c = cols, 1
    if grid_m == 1:
        if cols % 256 == 0:                  # lane-aligned column split
            tc, grid_c = cols // 2, 2
        elif m >= 16:                        # split rows instead
            tm = _round_up(-(-m // 2), 8)
            m_pad = _round_up(m, tm)
            grid_m = m_pad // tm
    return tm, m_pad, grid_m, tc, grid_c


def _fused_matmul(a_bf16, w_bf16, scale=None, shift=None):
    """y = [relu(a * scale + shift)] @ w   (bf16 in / bf16 out, f32 accumulate),
    grid-tiled over rows and (when useful) weight columns."""
    m, kdim = a_bf16.shape
    cols = w_bf16.shape[1]
    tm, m_pad, grid_m, tc, grid_c = _choose_tiles(m, kdim, cols)
    if m_pad != m:
        # Padded rows produce garbage (relu(shift) @ w) that is sliced off below:
        # wasted bandwidth only, never observed values.
        a_bf16 = jnp.pad(a_bf16, ((0, m_pad - m), (0, 0)))

    in_specs = [pl.BlockSpec((tm, kdim), lambda i, j: (i, 0))]
    args = [a_bf16]
    if scale is not None:
        in_specs += [pl.BlockSpec((1, kdim), lambda i, j: (0, 0)),
                     pl.BlockSpec((1, kdim), lambda i, j: (0, 0))]
        args += [scale.reshape(1, kdim).astype(jnp.float32),
                 shift.reshape(1, kdim).astype(jnp.float32)]
        kernel = _bn_relu_matmul_kernel
    else:
        kernel = _matmul_kernel
    in_specs += [pl.BlockSpec((kdim, tc), lambda i, j: (0, j))]
    args += [w_bf16]

    out = pl.pallas_call(
        kernel,
        out_shape=jax.ShapeDtypeStruct((m_pad, cols), jnp.bfloat16),
        grid=(grid_m, grid_c),
        in_specs=in_specs,
        out_specs=pl.BlockSpec((tm, tc), lambda i, j: (i, j)),
        compiler_params=pltpu.CompilerParams(
            dimension_semantics=("parallel", "parallel"),
            vmem_limit_bytes=VMEM_LIMIT_BYTES),
    )(*args)
    return out[:m] if m_pad != m else out


# ---------------------------------------------------------------------------
# Plain-JAX glue: weight reshape and col2im overlap-add
# ---------------------------------------------------------------------------
def _weight_to_matrix(w_pt):
    """ConvTranspose2d weight (Ci, Co, k, k) -> bf16 (Ci, k*k*Co), column order
    (ky, kx, co).  No kernel flip needed in this formulation and no lane padding
    (the final layer's 16 columns are stored un-padded)."""
    ci, co, k, _ = w_pt.shape
    return jnp.transpose(w_pt, (0, 2, 3, 1)).reshape(ci, k * k * co).astype(jnp.bfloat16)


def _col2im_add(y_cols, n, hi, wi, k, s, p, co):
    """Overlap-add per-tap matmul output back into an image (f32 accumulation).

    y_cols: (n*hi*wi, k*k*co) bf16, columns ordered (ky, kx, co).  Output pixel
    (hi*s - p + ky, wi*s - p + kx) accumulates tap (ky, kx) of input (hi, wi),
    which is exactly the ConvTranspose2d definition.
    """
    y = y_cols.astype(jnp.float32).reshape(n, hi, wi, k, k, co)
    hf, wf = (hi - 1) * s + k, (wi - 1) * s + k
    out = jnp.zeros((n, hf, wf, co), jnp.float32)
    for ky in range(k):
        for kx in range(k):
            out = out.at[:, ky:ky + (hi - 1) * s + 1:s,
                            kx:kx + (wi - 1) * s + 1:s, :].add(y[:, :, :, ky, kx, :])
    ho, wo = hf - 2 * p, wf - 2 * p
    return out[:, p:p + ho, p:p + wo, :], (ho, wo)


def init_params(key):
    params = []
    for (ci, co, k, _s, _p, bn) in LAYER_CFG:
        key, wk = jax.random.split(key)
        w = 0.02 * jax.random.normal(wk, (ci, co, k, k), jnp.float32)
        gamma = jnp.ones((co,), jnp.float32) if bn else None   # BN default init
        beta = jnp.zeros((co,), jnp.float32) if bn else None
        params.append((w, gamma, beta))
    return params


@jax.jit
def mnist_gen_forward(params, x_nchw):
    n = x_nchw.shape[0]
    # Layer 1 has a 1x1 input -> it degenerates to a plain FC matmul (N,64)@(64,1024).
    act = x_nchw.reshape(n, -1).astype(jnp.bfloat16)
    hi = wi = 1
    scale = shift = None
    img = None
    for (w, gamma, beta), (_ci, co, k, s, p, bn) in zip(params, LAYER_CFG):
        w_mat = _weight_to_matrix(w)
        y = _fused_matmul(act, w_mat, scale, shift)            # (m, k*k*co) bf16
        img, (ho, wo) = _col2im_add(y, n, hi, wi, k, s, p, co)  # f32 image (NHWC)
        if bn:
            # Training-mode BatchNorm batch stats (biased var) in a single fused
            # sum / sum-of-squares pass, folded to per-channel scale/shift that
            # the NEXT layer's kernel fuses with ReLU at its matmul input.
            cnt = n * ho * wo
            flat = img.reshape(cnt, co)
            mean = jnp.sum(flat, axis=0) / cnt
            var = jnp.maximum(jnp.sum(flat * flat, axis=0) / cnt - mean * mean, 0.0)
            scale = gamma * lax.rsqrt(var + EPS)
            shift = beta - mean * scale
        else:
            scale = shift = None
        act = img.reshape(n * ho * wo, co).astype(jnp.bfloat16)
        hi, wi = ho, wo
    # Final layer has no BN: tanh on the tiny (N,28,28,1) image, left in XLA.
    out = jnp.tanh(img)
    return jnp.transpose(out, (0, 3, 1, 2))                    # NHWC -> NCHW


# ---------------------------------------------------------------------------
# Reference (lax.conv_general_dilated).  Conv operands are bf16 with f32
# accumulation and inter-layer activations are rounded to bf16, matching the
# kernel path's MXU / storage precision; BN stats, ReLU and tanh stay f32.
# ---------------------------------------------------------------------------
def mnist_gen_reference(params, x_nchw):
    x = x_nchw.astype(jnp.float32)
    for (w, gamma, beta), (_ci, _co, k, s, p, bn) in zip(params, LAYER_CFG):
        wf = jnp.transpose(jnp.flip(w, axis=(2, 3)), (1, 0, 2, 3))  # OIHW
        pad = k - 1 - p
        y = lax.conv_general_dilated(
            x.astype(jnp.bfloat16), wf.astype(jnp.bfloat16),
            window_strides=(1, 1), padding=[(pad, pad), (pad, pad)],
            lhs_dilation=(s, s), dimension_numbers=('NCHW', 'OIHW', 'NCHW'),
            preferred_element_type=jnp.float32)
        if bn:
            mean = jnp.mean(y, axis=(0, 2, 3), keepdims=True)
            var = jnp.mean(jnp.square(y - mean), axis=(0, 2, 3), keepdims=True)
            y = (y - mean) * lax.rsqrt(var + EPS)
            y = y * gamma[None, :, None, None] + beta[None, :, None, None]
            y = jnp.maximum(y, 0.0)
            y = y.astype(jnp.bfloat16).astype(jnp.float32)   # match bf16 storage
        else:
            y = jnp.tanh(y)
        x = y
    return x


if __name__ == "__main__":
    key = jax.random.PRNGKey(0)
    pkey, xkey = jax.random.split(key)
    params = init_params(pkey)
    # Latent input, shaped exactly like the PyTorch module expects: (N, 64, 1, 1)
    x = jax.random.normal(xkey, (2, 64, 1, 1), jnp.float32)

    out = jax.block_until_ready(mnist_gen_forward(params, x))
    assert out.shape == (2, 1, 28, 28), out.shape
    assert bool(jnp.all(jnp.isfinite(out)))

    ref = jax.block_until_ready(mnist_gen_reference(params, x))
    assert bool(jnp.allclose(out, ref, atol=3e-2, rtol=3e-2)), float(
        jnp.max(jnp.abs(out - ref)))

    print("KERNEL_OK")
</pallas_src>

<mosaic_0001>
module attributes {stable_mosaic.version = 11 : i64} {
  func.func @_matmul_kernel(%arg0: i32, %arg1: i32, %arg2: memref<8x64xbf16, #tpu.memory_space<vmem>>, %arg3: memref<64x512xbf16, #tpu.memory_space<vmem>>, %arg4: memref<8x512xbf16, #tpu.memory_space<vmem>>) attributes {dimension_semantics = [#tpu.dimension_semantics<parallel>, #tpu.dimension_semantics<parallel>], iteration_bounds = array<i64: 1, 2>, scalar_prefetch = 0 : i64, scratch_operands = 0 : i64, tpu.core_type = #tpu.core_type<tc>, window_params = [{transform_indices = @transform_0, window_bounds = array<i64: 8, 64>}, {transform_indices = @transform_1, window_bounds = array<i64: 64, 512>}, {transform_indices = @transform_2, window_bounds = array<i64: 8, 512>}]} {
    %c0 = arith.constant 0 : index
    %c0_0 = arith.constant 0 : index
    %0 = vector.load %arg2[%c0, %c0_0] : memref<8x64xbf16, #tpu.memory_space<vmem>>, vector<8x64xbf16>
    %c0_1 = arith.constant 0 : index
    %c0_2 = arith.constant 0 : index
    %1 = vector.load %arg3[%c0_1, %c0_2] : memref<64x512xbf16, #tpu.memory_space<vmem>>, vector<64x512xbf16>
    %cst = arith.constant dense<0.000000e+00> : vector<8x512xf32>
    %2 = tpu.matmul %0, %1, %cst {dimension_numbers = #tpu.dot_dimension_numbers<[1], [0], [0], [1], [0, 0, 1, 1], [], []>} : vector<8x64xbf16>, vector<64x512xbf16>, vector<8x512xf32> -> vector<8x512xf32>
    %3 = arith.truncf %2 : vector<8x512xf32> to vector<8x512xbf16>
    %c0_3 = arith.constant 0 : index
    %c0_4 = arith.constant 0 : index
    %4 = vector.load %arg4[%c0_3, %c0_4] : memref<8x512xbf16, #tpu.memory_space<vmem>>, vector<8x512xbf16>
    tpu.vector_store %arg4[%c0_3, %c0_4], %3 {strides = array<i32>} : memref<8x512xbf16, #tpu.memory_space<vmem>>, vector<8x512xbf16>,
    return
  }
  func.func @transform_0(%arg0: i32, %arg1: i32) -> (i32, i32) {
    %c0_i32 = arith.constant 0 : i32
    %c0_i32_0 = arith.constant 0 : i32
    return %arg0, %c0_i32 : i32, i32
  }
  func.func @transform_1(%arg0: i32, %arg1: i32) -> (i32, i32) {
    %c0_i32 = arith.constant 0 : i32
    %c0_i32_0 = arith.constant 0 : i32
    return %c0_i32, %arg1 : i32, i32
  }
  func.func @transform_2(%arg0: i32, %arg1: i32) -> (i32, i32) {
    %c0_i32 = arith.constant 0 : i32
    return %arg0, %arg1 : i32, i32
  }
}

module attributes {stable_mosaic.version = 11 : i64} {
  func.func @_bn_relu_matmul_kernel(%arg0: i32, %arg1: i32, %arg2: memref<8x256xbf16, #tpu.memory_space<vmem>>, %arg3: memref<1x256xf32, #tpu.memory_space<vmem>>, %arg4: memref<1x256xf32, #tpu.memory_space<vmem>>, %arg5: memref<256x1024xbf16, #tpu.memory_space<vmem>>, %arg6: memref<8x1024xbf16, #tpu.memory_space<vmem>>) attributes {dimension_semantics = [#tpu.dimension_semantics<parallel>, #tpu.dimension_semantics<parallel>], iteration_bounds = array<i64: 1, 2>, scalar_prefetch = 0 : i64, scratch_operands = 0 : i64, tpu.core_type = #tpu.core_type<tc>, window_params = [{transform_indices = @transform_0, window_bounds = array<i64: 8, 256>}, {pipeline_mode = #tpu.pipeline_mode<synchronous>, transform_indices = @transform_1, window_bounds = array<i64: 1, 256>}, {pipeline_mode = #tpu.pipeline_mode<synchronous>, transform_indices = @transform_2, window_bounds = array<i64: 1, 256>}, {transform_indices = @transform_3, window_bounds = array<i64: 256, 1024>}, {transform_indices = @transform_4, window_bounds = array<i64: 8, 1024>}]} {
    %c0 = arith.constant 0 : index
    %c0_0 = arith.constant 0 : index
    %0 = vector.load %arg2[%c0, %c0_0] : memref<8x256xbf16, #tpu.memory_space<vmem>>, vector<8x256xbf16>
    %1 = arith.extf %0 : vector<8x256xbf16> to vector<8x256xf32>
    %c0_1 = arith.constant 0 : index
    %c0_2 = arith.constant 0 : index
    %2 = vector.load %arg3[%c0_1, %c0_2] : memref<1x256xf32, #tpu.memory_space<vmem>>, vector<1x256xf32>
    %3 = vector.broadcast %2 : vector<1x256xf32> to vector<8x256xf32>
    %4 = arith.mulf %1, %3 : vector<8x256xf32>
    %c0_3 = arith.constant 0 : index
    %c0_4 = arith.constant 0 : index
    %5 = vector.load %arg4[%c0_3, %c0_4] : memref<1x256xf32, #tpu.memory_space<vmem>>, vector<1x256xf32>
    %6 = vector.broadcast %5 : vector<1x256xf32> to vector<8x256xf32>
    %7 = arith.addf %4, %6 : vector<8x256xf32>
    %cst = arith.constant 0.000000e+00 : f32
    %8 = vector.broadcast %cst : f32 to vector<8x256xf32>
    %9 = arith.maximumf %7, %8 : vector<8x256xf32>
    %10 = arith.truncf %9 : vector<8x256xf32> to vector<8x256xbf16>
    %c0_5 = arith.constant 0 : index
    %c0_6 = arith.constant 0 : index
    %11 = vector.load %arg5[%c0_5, %c0_6] : memref<256x1024xbf16, #tpu.memory_space<vmem>>, vector<256x1024xbf16>
    %cst_7 = arith.constant dense<0.000000e+00> : vector<8x1024xf32>
    %12 = tpu.matmul %10, %11, %cst_7 {dimension_numbers = #tpu.dot_dimension_numbers<[1], [0], [0], [1], [0, 0, 1, 1], [], []>} : vector<8x256xbf16>, vector<256x1024xbf16>, vector<8x1024xf32> -> vector<8x1024xf32>
    %13 = arith.truncf %12 : vector<8x1024xf32> to vector<8x1024xbf16>
    %c0_8 = arith.constant 0 : index
    %c0_9 = arith.constant 0 : index
    %14 = vector.load %arg6[%c0_8, %c0_9] : memref<8x1024xbf16, #tpu.memory_space<vmem>>, vector<8x1024xbf16>
    tpu.vector_store %arg6[%c0_8, %c0_9], %13 {strides = array<i32>} : memref<8x1024xbf16, #tpu.memory_space<vmem>>, vector<8x1024xbf16>,
    return
  }
  func.func @transform_0(%arg0: i32, %arg1: i32) -> (i32, i32) {
    %c0_i32 = arith.constant 0 : i32
    %c0_i32_0 = arith.constant 0 : i32
    return %arg0, %c0_i32 : i32, i32
  }
  func.func @transform_1(%arg0: i32, %arg1: i32) -> (i32, i32) {
    %c0_i32 = arith.constant 0 : i32
    %c0_i32_0 = arith.constant 0 : i32
    %c0_i32_1 = arith.constant 0 : i32
    return %c0_i32, %c0_i32_0 : i32, i32
  }
  func.func @transform_2(%arg0: i32, %arg1: i32) -> (i32, i32) {
    %c0_i32 = arith.constant 0 : i32
    %c0_i32_0 = arith.constant 0 : i32
    %c0_i32_1 = arith.constant 0 : i32
    return %c0_i32, %c0_i32_0 : i32, i32
  }
  func.func @transform_3(%arg0: i32, %arg1: i32) -> (i32, i32) {
    %c0_i32 = arith.constant 0 : i32
    %c0_i32_0 = arith.constant 0 : i32
    return %c0_i32, %arg1 : i32, i32
  }
  func.func @transform_4(%arg0: i32, %arg1: i32) -> (i32, i32) {
    %c0_i32 = arith.constant 0 : i32
    return %arg0, %arg1 : i32, i32
  }
}

module attributes {stable_mosaic.version = 11 : i64} {
  func.func @_bn_relu_matmul_kernel(%arg0: i32, %arg1: i32, %arg2: memref<16x128xbf16, #tpu.memory_space<vmem>>, %arg3: memref<1x128xf32, #tpu.memory_space<vmem>>, %arg4: memref<1x128xf32, #tpu.memory_space<vmem>>, %arg5: memref<128x576xbf16, #tpu.memory_space<vmem>>, %arg6: memref<16x576xbf16, #tpu.memory_space<vmem>>) attributes {dimension_semantics = [#tpu.dimension_semantics<parallel>, #tpu.dimension_semantics<parallel>], iteration_bounds = array<i64: 2, 1>, scalar_prefetch = 0 : i64, scratch_operands = 0 : i64, tpu.core_type = #tpu.core_type<tc>, window_params = [{transform_indices = @transform_0, window_bounds = array<i64: 16, 128>}, {pipeline_mode = #tpu.pipeline_mode<synchronous>, transform_indices = @transform_1, window_bounds = array<i64: 1, 128>}, {pipeline_mode = #tpu.pipeline_mode<synchronous>, transform_indices = @transform_2, window_bounds = array<i64: 1, 128>}, {transform_indices = @transform_3, window_bounds = array<i64: 128, 576>}, {transform_indices = @transform_4, window_bounds = array<i64: 16, 576>}]} {
    %c0 = arith.constant 0 : index
    %c0_0 = arith.constant 0 : index
    %0 = vector.load %arg2[%c0, %c0_0] : memref<16x128xbf16, #tpu.memory_space<vmem>>, vector<16x128xbf16>
    %1 = arith.extf %0 : vector<16x128xbf16> to vector<16x128xf32>
    %c0_1 = arith.constant 0 : index
    %c0_2 = arith.constant 0 : index
    %2 = vector.load %arg3[%c0_1, %c0_2] : memref<1x128xf32, #tpu.memory_space<vmem>>, vector<1x128xf32>
    %3 = vector.broadcast %2 : vector<1x128xf32> to vector<16x128xf32>
    %4 = arith.mulf %1, %3 : vector<16x128xf32>
    %c0_3 = arith.constant 0 : index
    %c0_4 = arith.constant 0 : index
    %5 = vector.load %arg4[%c0_3, %c0_4] : memref<1x128xf32, #tpu.memory_space<vmem>>, vector<1x128xf32>
    %6 = vector.broadcast %5 : vector<1x128xf32> to vector<16x128xf32>
    %7 = arith.addf %4, %6 : vector<16x128xf32>
    %cst = arith.constant 0.000000e+00 : f32
    %8 = vector.broadcast %cst : f32 to vector<16x128xf32>
    %9 = arith.maximumf %7, %8 : vector<16x128xf32>
    %10 = arith.truncf %9 : vector<16x128xf32> to vector<16x128xbf16>
    %c0_5 = arith.constant 0 : index
    %c0_6 = arith.constant 0 : index
    %11 = vector.load %arg5[%c0_5, %c0_6] : memref<128x576xbf16, #tpu.memory_space<vmem>>, vector<128x576xbf16>
    %cst_7 = arith.constant dense<0.000000e+00> : vector<16x576xf32>
    %12 = tpu.matmul %10, %11, %cst_7 {dimension_numbers = #tpu.dot_dimension_numbers<[1], [0], [0], [1], [0, 0, 1, 1], [], []>} : vector<16x128xbf16>, vector<128x576xbf16>, vector<16x576xf32> -> vector<16x576xf32>
    %13 = arith.truncf %12 : vector<16x576xf32> to vector<16x576xbf16>
    %c0_8 = arith.constant 0 : index
    %c0_9 = arith.constant 0 : index
    %14 = vector.load %arg6[%c0_8, %c0_9] : memref<16x576xbf16, #tpu.memory_space<vmem>>, vector<16x576xbf16>
    tpu.vector_store %arg6[%c0_8, %c0_9], %13 {strides = array<i32>} : memref<16x576xbf16, #tpu.memory_space<vmem>>, vector<16x576xbf16>,
    return
  }
  func.func @transform_0(%arg0: i32, %arg1: i32) -> (i32, i32) {
    %c0_i32 = arith.constant 0 : i32
    %c0_i32_0 = arith.constant 0 : i32
    return %arg0, %c0_i32 : i32, i32
  }
  func.func @transform_1(%arg0: i32, %arg1: i32) -> (i32, i32) {
    %c0_i32 = arith.constant 0 : i32
    %c0_i32_0 = arith.constant 0 : i32
    %c0_i32_1 = arith.constant 0 : i32
    return %c0_i32, %c0_i32_0 : i32, i32
  }
  func.func @transform_2(%arg0: i32, %arg1: i32) -> (i32, i32) {
    %c0_i32 = arith.constant 0 : i32
    %c0_i32_0 = arith.constant 0 : i32
    %c0_i32_1 = arith.constant 0 : i32
    return %c0_i32, %c0_i32_0 : i32, i32
  }
  func.func @transform_3(%arg0: i32, %arg1: i32) -> (i32, i32) {
    %c0_i32 = arith.constant 0 : i32
    %c0_i32_0 = arith.constant 0 : i32
    return %c0_i32, %arg1 : i32, i32
  }
  func.func @transform_4(%arg0: i32, %arg1: i32) -> (i32, i32) {
    %c0_i32 = arith.constant 0 : i32
    return %arg0, %arg1 : i32, i32
  }
}

module attributes {stable_mosaic.version = 11 : i64} {
  func.func @_bn_relu_matmul_kernel(%arg0: i32, %arg1: i32, %arg2: memref<104x64xbf16, #tpu.memory_space<vmem>>, %arg3: memref<1x64xf32, #tpu.memory_space<vmem>>, %arg4: memref<1x64xf32, #tpu.memory_space<vmem>>, %arg5: memref<64x256xbf16, #tpu.memory_space<vmem>>, %arg6: memref<104x256xbf16, #tpu.memory_space<vmem>>) attributes {dimension_semantics = [#tpu.dimension_semantics<parallel>, #tpu.dimension_semantics<parallel>], iteration_bounds = array<i64: 1, 2>, scalar_prefetch = 0 : i64, scratch_operands = 0 : i64, tpu.core_type = #tpu.core_type<tc>, window_params = [{transform_indices = @transform_0, window_bounds = array<i64: 104, 64>}, {pipeline_mode = #tpu.pipeline_mode<synchronous>, transform_indices = @transform_1, window_bounds = array<i64: 1, 64>}, {pipeline_mode = #tpu.pipeline_mode<synchronous>, transform_indices = @transform_2, window_bounds = array<i64: 1, 64>}, {transform_indices = @transform_3, window_bounds = array<i64: 64, 256>}, {transform_indices = @transform_4, window_bounds = array<i64: 104, 256>}]} {
    %c0 = arith.constant 0 : index
    %c0_0 = arith.constant 0 : index
    %0 = vector.load %arg2[%c0, %c0_0] : memref<104x64xbf16, #tpu.memory_space<vmem>>, vector<104x64xbf16>
    %1 = arith.extf %0 : vector<104x64xbf16> to vector<104x64xf32>
    %c0_1 = arith.constant 0 : index
    %c0_2 = arith.constant 0 : index
    %2 = vector.load %arg3[%c0_1, %c0_2] : memref<1x64xf32, #tpu.memory_space<vmem>>, vector<1x64xf32>
    %3 = vector.broadcast %2 : vector<1x64xf32> to vector<104x64xf32>
    %4 = arith.mulf %1, %3 : vector<104x64xf32>
    %c0_3 = arith.constant 0 : index
    %c0_4 = arith.constant 0 : index
    %5 = vector.load %arg4[%c0_3, %c0_4] : memref<1x64xf32, #tpu.memory_space<vmem>>, vector<1x64xf32>
    %6 = vector.broadcast %5 : vector<1x64xf32> to vector<104x64xf32>
    %7 = arith.addf %4, %6 : vector<104x64xf32>
    %cst = arith.constant 0.000000e+00 : f32
    %8 = vector.broadcast %cst : f32 to vector<104x64xf32>
    %9 = arith.maximumf %7, %8 : vector<104x64xf32>
    %10 = arith.truncf %9 : vector<104x64xf32> to vector<104x64xbf16>
    %c0_5 = arith.constant 0 : index
    %c0_6 = arith.constant 0 : index
    %11 = vector.load %arg5[%c0_5, %c0_6] : memref<64x256xbf16, #tpu.memory_space<vmem>>, vector<64x256xbf16>
    %cst_7 = arith.constant dense<0.000000e+00> : vector<104x256xf32>
    %12 = tpu.matmul %10, %11, %cst_7 {dimension_numbers = #tpu.dot_dimension_numbers<[1], [0], [0], [1], [0, 0, 1, 1], [], []>} : vector<104x64xbf16>, vector<64x256xbf16>, vector<104x256xf32> -> vector<104x256xf32>
    %13 = arith.truncf %12 : vector<104x256xf32> to vector<104x256xbf16>
    %c0_8 = arith.constant 0 : index
    %c0_9 = arith.constant 0 : index
    %14 = vector.load %arg6[%c0_8, %c0_9] : memref<104x256xbf16, #tpu.memory_space<vmem>>, vector<104x256xbf16>
    tpu.vector_store %arg6[%c0_8, %c0_9], %13 {strides = array<i32>} : memref<104x256xbf16, #tpu.memory_space<vmem>>, vector<104x256xbf16>,
    return
  }
  func.func @transform_0(%arg0: i32, %arg1: i32) -> (i32, i32) {
    %c0_i32 = arith.constant 0 : i32
    %c0_i32_0 = arith.constant 0 : i32
    return %arg0, %c0_i32 : i32, i32
  }
  func.func @transform_1(%arg0: i32, %arg1: i32) -> (i32, i32) {
    %c0_i32 = arith.constant 0 : i32
    %c0_i32_0 = arith.constant 0 : i32
    %c0_i32_1 = arith.constant 0 : i32
    return %c0_i32, %c0_i32_0 : i32, i32
  }
  func.func @transform_2(%arg0: i32, %arg1: i32) -> (i32, i32) {
    %c0_i32 = arith.constant 0 : i32
    %c0_i32_0 = arith.constant 0 : i32
    %c0_i32_1 = arith.constant 0 : i32
    return %c0_i32, %c0_i32_0 : i32, i32
  }
  func.func @transform_3(%arg0: i32, %arg1: i32) -> (i32, i32) {
    %c0_i32 = arith.constant 0 : i32
    %c0_i32_0 = arith.constant 0 : i32
    return %c0_i32, %arg1 : i32, i32
  }
  func.func @transform_4(%arg0: i32, %arg1: i32) -> (i32, i32) {
    %c0_i32 = arith.constant 0 : i32
    return %arg0, %arg1 : i32, i32
  }
}

module attributes {stable_mosaic.version = 11 : i64} {
  func.func @_bn_relu_matmul_kernel(%arg0: i32, %arg1: i32, %arg2: memref<200x32xbf16, #tpu.memory_space<vmem>>, %arg3: memref<1x32xf32, #tpu.memory_space<vmem>>, %arg4: memref<1x32xf32, #tpu.memory_space<vmem>>, %arg5: memref<32x16xbf16, #tpu.memory_space<vmem>>, %arg6: memref<200x16xbf16, #tpu.memory_space<vmem>>) attributes {dimension_semantics = [#tpu.dimension_semantics<parallel>, #tpu.dimension_semantics<parallel>], iteration_bounds = array<i64: 2, 1>, scalar_prefetch = 0 : i64, scratch_operands = 0 : i64, tpu.core_type = #tpu.core_type<tc>, window_params = [{transform_indices = @transform_0, window_bounds = array<i64: 200, 32>}, {pipeline_mode = #tpu.pipeline_mode<synchronous>, transform_indices = @transform_1, window_bounds = array<i64: 1, 32>}, {pipeline_mode = #tpu.pipeline_mode<synchronous>, transform_indices = @transform_2, window_bounds = array<i64: 1, 32>}, {transform_indices = @transform_3, window_bounds = array<i64: 32, 16>}, {transform_indices = @transform_4, window_bounds = array<i64: 200, 16>}]} {
    %c0 = arith.constant 0 : index
    %c0_0 = arith.constant 0 : index
    %0 = vector.load %arg2[%c0, %c0_0] : memref<200x32xbf16, #tpu.memory_space<vmem>>, vector<200x32xbf16>
    %1 = arith.extf %0 : vector<200x32xbf16> to vector<200x32xf32>
    %c0_1 = arith.constant 0 : index
    %c0_2 = arith.constant 0 : index
    %2 = vector.load %arg3[%c0_1, %c0_2] : memref<1x32xf32, #tpu.memory_space<vmem>>, vector<1x32xf32>
    %3 = vector.broadcast %2 : vector<1x32xf32> to vector<200x32xf32>
    %4 = arith.mulf %1, %3 : vector<200x32xf32>
    %c0_3 = arith.constant 0 : index
    %c0_4 = arith.constant 0 : index
    %5 = vector.load %arg4[%c0_3, %c0_4] : memref<1x32xf32, #tpu.memory_space<vmem>>, vector<1x32xf32>
    %6 = vector.broadcast %5 : vector<1x32xf32> to vector<200x32xf32>
    %7 = arith.addf %4, %6 : vector<200x32xf32>
    %cst = arith.constant 0.000000e+00 : f32
    %8 = vector.broadcast %cst : f32 to vector<200x32xf32>
    %9 = arith.maximumf %7, %8 : vector<200x32xf32>
    %10 = arith.truncf %9 : vector<200x32xf32> to vector<200x32xbf16>
    %c0_5 = arith.constant 0 : index
    %c0_6 = arith.constant 0 : index
    %11 = vector.load %arg5[%c0_5, %c0_6] : memref<32x16xbf16, #tpu.memory_space<vmem>>, vector<32x16xbf16>
    %cst_7 = arith.constant dense<0.000000e+00> : vector<200x16xf32>
    %12 = tpu.matmul %10, %11, %cst_7 {dimension_numbers = #tpu.dot_dimension_numbers<[1], [0], [0], [1], [0, 0, 1, 1], [], []>} : vector<200x32xbf16>, vector<32x16xbf16>, vector<200x16xf32> -> vector<200x16xf32>
    %13 = arith.truncf %12 : vector<200x16xf32> to vector<200x16xbf16>
    %c0_8 = arith.constant 0 : index
    %c0_9 = arith.constant 0 : index
    %14 = vector.load %arg6[%c0_8, %c0_9] : memref<200x16xbf16, #tpu.memory_space<vmem>>, vector<200x16xbf16>
    tpu.vector_store %arg6[%c0_8, %c0_9], %13 {strides = array<i32>} : memref<200x16xbf16, #tpu.memory_space<vmem>>, vector<200x16xbf16>,
    return
  }
  func.func @transform_0(%arg0: i32, %arg1: i32) -> (i32, i32) {
    %c0_i32 = arith.constant 0 : i32
    %c0_i32_0 = arith.constant 0 : i32
    return %arg0, %c0_i32 : i32, i32
  }
  func.func @transform_1(%arg0: i32, %arg1: i32) -> (i32, i32) {
    %c0_i32 = arith.constant 0 : i32
    %c0_i32_0 = arith.constant 0 : i32
    %c0_i32_1 = arith.constant 0 : i32
    return %c0_i32, %c0_i32_0 : i32, i32
  }
  func.func @transform_2(%arg0: i32, %arg1: i32) -> (i32, i32) {
    %c0_i32 = arith.constant 0 : i32
    %c0_i32_0 = arith.constant 0 : i32
    %c0_i32_1 = arith.constant 0 : i32
    return %c0_i32, %c0_i32_0 : i32, i32
  }
  func.func @transform_3(%arg0: i32, %arg1: i32) -> (i32, i32) {
    %c0_i32 = arith.constant 0 : i32
    %c0_i32_0 = arith.constant 0 : i32
    return %c0_i32, %arg1 : i32, i32
  }
  func.func @transform_4(%arg0: i32, %arg1: i32) -> (i32, i32) {
    %c0_i32 = arith.constant 0 : i32
    return %arg0, %arg1 : i32, i32
  }
}

</mosaic_0001>

<bundles_post_ra>
// kernel: mnist_gen_forward.5
= control target key start
LH: loop header
LB: loop body
LE: loop exit
PB: predicated region body
PF: predicated region fallthrough
CT: control target
= control target key end

     0   :  { %s697_s9 = smov 0   ;;  %s699_s10 = smov 0   ;;  %s783_s0 = inlined_call_operand.vmem [shape: bf16[8,64], index: 0, kind: input, shape index: {}]   ;;  %s784_s1 = inlined_call_operand.vmem [shape: bf16[64,1024], index: 1, kind: input, shape index: {}]   ;;  %s785_s2 = inlined_call_operand.vmem [shape: bf16[8,1024], index: 2, kind: output, shape index: {}]  }
   0x1   :  { %s701_s11 = smov 0   ;;  %s703_s12 = smov 0  }
   0x2   :  { %s705_s13 = smov 0  }
   0x3 LB: > { %s21_s14 = sadd.s32 1, %s675_s12  ;;  %p64_p1 = scmp.ne.s32.totalorder %s667_s10, %s663_s9  ;;  %s679_s13 = sphi %s705_s13, %s12_s13   ;;  %s675_s12 = sphi %s703_s12, %s789_s12   ;;  %s671_s11 = sphi %s701_s11, %s788_s11   ;;  %s667_s10 = sphi %s699_s10, %s787_s10   ;;  %s663_s9 = sphi %s697_s9, %s786_s9  }
   0x4   : > { %p22_p0 = scmp.ge.s32.totalorder %s21_s14, 2  ;;  %p65_p2 = scmp.eq.s32.totalorder %s679_s13, 0 }
   0x5   : > { %s57_s16 = sadd.s32 1, %s667_s10  ;;  %p543_p5 = scmp.ge.s32.totalorder %s679_s13, 2 }
   0x6   : > { %s791_s14 = smov (%p22_p0, %s21_s14), 0  ;;  %p66_p3 = por %p65_p2, %p64_p1 }
   0x7   : > { %s54_s15 = ssub.s32 %s675_s12, %s791_s14  ;;  %125 = sbr.rel (%p543_p5) target bundleno = 26 (0x1a), region = 20 }
   0x8   : > { %p55_p4 = scmp.eq.s32.totalorder %s54_s15, 0 }
   0xa   : > { %s732_s17 = scalar_select %p55_p4, %s667_s10, %s57_s16  }
   0xe   : > { %128 = sbr.rel (!%p66_p3) target bundleno = 26 (0x1a), region = 24  ;;  %s130_s18 = sand.u32 (%p66_p3), 1, %s667_s10  }
   0xf   : > { %s573_s19 = sshll.u32 (%p66_p3), %s675_s12, 4  ;;  %s544_s20 = sshll.u32 (%p66_p3), %s130_s18, 7 }
  0x10   : > { %s740_s23 = scalar_lea.vmem (%p66_p3), %s784_s1, %s573_s19  ;;  %s132_s24 = scalar_lea.vmem (%p66_p3), [#allocation2], %s544_s20 }
  0x11   : > { %v148_v0 = vld [vmem:[%s740_s23] sm:$0xff] (%p66_p3)  ;;  %v150_v1 = vld [vmem:[%s740_s23 + $0x8] sm:$0xff] (%p66_p3) }
  0x12   : > { %v152_v2 = vld [vmem:[%s740_s23 + $0x20] sm:$0xff] (%p66_p3)  ;;  %149 = vst [vmem:[%s132_s24] sm:$0xff] (%p66_p3), %v148_v0  ;;  %151 = vst [vmem:[%s132_s24 + $0x8] sm:$0xff] (%p66_p3), %v150_v1  ;;  %v154_v3 = vld [vmem:[%s740_s23 + $0x28] sm:$0xff] (%p66_p3) }
  0x13   : > { %153 = vst [vmem:[%s132_s24 + $0x10] sm:$0xff] (%p66_p3), %v152_v2  ;;  %v156_v4 = vld [vmem:[%s740_s23 + $0x40] sm:$0xff] (%p66_p3)  ;;  %v158_v5 = vld [vmem:[%s740_s23 + $0x48] sm:$0xff] (%p66_p3)  ;;  %155 = vst [vmem:[%s132_s24 + $0x18] sm:$0xff] (%p66_p3), %v154_v3 }
  0x14   : > { %157 = vst [vmem:[%s132_s24 + $0x20] sm:$0xff] (%p66_p3), %v156_v4  ;;  %159 = vst [vmem:[%s132_s24 + $0x28] sm:$0xff] (%p66_p3), %v158_v5  ;;  %v160_v6 = vld [vmem:[%s740_s23 + $0x60] sm:$0xff] (%p66_p3)  ;;  %v162_v7 = vld [vmem:[%s740_s23 + $0x68] sm:$0xff] (%p66_p3) }
  0x15   : > { %v164_v8 = vld [vmem:[%s740_s23 + $0x80] sm:$0xff]  ;;  %161 = vst [vmem:[%s132_s24 + $0x30] sm:$0xff] %v160_v6  ;;  %163 = vst [vmem:[%s132_s24 + $0x38] sm:$0xff] %v162_v7  ;;  %v166_v9 = vld [vmem:[%s740_s23 + $0x88] sm:$0xff] }
  0x16   : > { %165 = vst [vmem:[%s132_s24 + $0x40] sm:$0xff] %v164_v8  ;;  %v168_v10 = vld [vmem:[%s740_s23 + $0xa0] sm:$0xff]  ;;  %v170_v11 = vld [vmem:[%s740_s23 + $0xa8] sm:$0xff]  ;;  %167 = vst [vmem:[%s132_s24 + $0x48] sm:$0xff] %v166_v9 }
  0x17   : > { %169 = vst [vmem:[%s132_s24 + $0x50] sm:$0xff] %v168_v10  ;;  %171 = vst [vmem:[%s132_s24 + $0x58] sm:$0xff] %v170_v11  ;;  %v172_v12 = vld [vmem:[%s740_s23 + $0xc0] sm:$0xff]  ;;  %v174_v13 = vld [vmem:[%s740_s23 + $0xc8] sm:$0xff] }
  0x18   : > { %v176_v14 = vld [vmem:[%s740_s23 + $0xe0] sm:$0xff]  ;;  %173 = vst [vmem:[%s132_s24 + $0x60] sm:$0xff] %v172_v12  ;;  %175 = vst [vmem:[%s132_s24 + $0x68] sm:$0xff] %v174_v13  ;;  %v178_v15 = vld [vmem:[%s740_s23 + $0xe8] sm:$0xff] }
  0x19   : > { %177 = vst [vmem:[%s132_s24 + $0x70] sm:$0xff] %v176_v14  ;;  %179 = vst [vmem:[%s132_s24 + $0x78] sm:$0xff] %v178_v15 }
  0x1a PF: > { %p547_p6 = scmp.ge.s32.totalorder %s679_s13, 1  ;;  %p184_p7 = scmp.lt.s32.totalorder %s679_s13, 3 }
  0x1c   : > { %p185_p8 = pnand %p547_p6, %p184_p7 }
  0x1d   : > { %s191_s25 = sand.u32 (!%p185_p8), 1, %s663_s9   ;;  %v681_v16 = vmov (!%p185_p8), 0   ;;  %v236_v33 = vld [vmem:[%s783_s0] sm:$0xf] (!%p185_p8)  ;;  %vm333_vm0 = vcmask (!%p185_p8), 523264   ;;  %s549_s30 = sshll.u32 (!%p185_p8), %s671_s11, 2 }
  0x1e   : > { %188 = sbr.rel (%p185_p8) target bundleno = 265 (0x109), region = 47  ;;  %s548_s26 = sshll.u32 (!%p185_p8), %s191_s25, 7  ;;  %369 = vmatprep.mubr.bf16.mxu0 (!%p185_p8), %v681_v16  ;;  %410 = vmatprep.mubr.bf16.mxu1 (!%p185_p8), %v681_v16 }
  0x1f   : > { %s193_s27 = scalar_lea.vmem (!%p185_p8), [#allocation2], %s548_s26  ;;  %p228_p9 = scmp.lt.s32.totalorder (!%p185_p8), %s549_s30, 7 }
  0x20   : > { %v617_v17 = vld [vmem:[%s193_s27 + $0x4] ss:$16 sps:$4 sm:$0xff] (!%p185_p8)   ;;  %v619_v18 = vld [vmem:[%s193_s27 + $0xc] ss:$16 sps:$4 sm:$0xff] (!%p185_p8)   ;;  %v621_v19 = vld [vmem:[%s193_s27] ss:$16 sps:$4 sm:$0xff] (!%p185_p8)  }
  0x21   : > { %337 = vmatprep.subr.bf16.mxu0 (!%p185_p8), %v617_v17  ;;  %v622_v20 = vld [vmem:[%s193_s27 + $0x8] ss:$16 sps:$4 sm:$0xff] (!%p185_p8)   ;;  %378 = vmatprep.subr.bf16.mxu1 (!%p185_p8), %v619_v18  ;;  %v623_v21 = vld [vmem:[%s193_s27 + $0x24] ss:$16 sps:$4 sm:$0xff] (!%p185_p8)   ;;  %v625_v22 = vld [vmem:[%s193_s27 + $0x2c] ss:$16 sps:$4 sm:$0xff] (!%p185_p8)  }
  0x22   : > { %338 = vmatpush1.bf16.msra.mxu0 (!%p185_p8), %v621_v19  ;;  %379 = vmatpush1.bf16.msra.mxu1 (!%p185_p8), %v622_v20  ;;  %v627_v23 = vld [vmem:[%s193_s27 + $0x20] ss:$16 sps:$4 sm:$0xff] (!%p185_p8)   ;;  %v628_v24 = vld [vmem:[%s193_s27 + $0x28] ss:$16 sps:$4 sm:$0xff] (!%p185_p8)   ;;  %v629_v25 = vld [vmem:[%s193_s27 + $0x44] ss:$16 sps:$4 sm:$0xff] (!%p185_p8)  }
  0x23   : > { %339 = vmatprep.subr.bf16.mxu0 (!%p185_p8), %v623_v21  ;;  %380 = vmatprep.subr.bf16.mxu1 (!%p185_p8), %v625_v22  ;;  %v631_v26 = vld [vmem:[%s193_s27 + $0x4c] ss:$16 sps:$4 sm:$0xff] (!%p185_p8)   ;;  %v633_v27 = vld [vmem:[%s193_s27 + $0x40] ss:$16 sps:$4 sm:$0xff] (!%p185_p8)   ;;  %v634_v28 = vld [vmem:[%s193_s27 + $0x48] ss:$16 sps:$4 sm:$0xff] (!%p185_p8)  }
  0x24   : > { %v635_v29 = vld [vmem:[%s193_s27 + $0x64] ss:$16 sps:$4 sm:$0xff] (!%p185_p8)   ;;  %v637_v30 = vld [vmem:[%s193_s27 + $0x6c] ss:$16 sps:$4 sm:$0xff] (!%p185_p8)   ;;  %v639_v31 = vld [vmem:[%s193_s27 + $0x60] ss:$16 sps:$4 sm:$0xff] (!%p185_p8)  }
  0x25   : > { %v640_v32 = vld [vmem:[%s193_s27 + $0x68] ss:$16 sps:$4 sm:$0xff]   ;;  %s793_s30 = smov (!%p228_p9, %s549_s30), 7 }
  0x26   : > { %340 = vmatpush1.bf16.msra.mxu0 %v627_v23  ;;  %381 = vmatpush1.bf16.msra.mxu1 %v628_v24  ;;  %s550_s3 = sshll.u32 %s793_s30, 2 }
  0x27   : > { %341 = vmatprep.subr.bf16.mxu0 %v629_v25  ;;  %382 = vmatprep.subr.bf16.mxu1 %v631_v26  ;;  %s233_s6 = scalar_lea.vmem %s785_s2, %s550_s3 }
  0x2a   : > { %342 = vmatpush1.bf16.msra.mxu0 %v633_v27  ;;  %383 = vmatpush1.bf16.msra.mxu1 %v634_v28 }
  0x2b   : > { %343 = vmatprep.subr.bf16.mxu0 %v635_v29  ;;  %384 = vmatprep.subr.bf16.mxu1 %v637_v30 }
  0x2e   : > { %344 = vmatpush1.bf16.msra.mxu0 %v639_v31  ;;  %385 = vmatpush1.bf16.msra.mxu1 %v640_v32 }
  0x31   : > { %567 = vmatmul.mubr.msk.bf16.vlgmr.msra.gmra.mrb[0].mxu0 %vm333_vm0, %v236_v33  ;;  %568 = vmatmul.mubr.msk.bf16.vlgmr.msra.gmra.mrb[0].mxu1 %vm333_vm0, %v236_v33 }
 0x104   : > { %v371_v34 = vpop.f32.mrb[0].mxu0  ;;  %v412_v35 = vpop.f32.mrb[0].mxu1 }
 0x105   : > { %v373_v36 = vpop.f32.mrb[1].mxu0  ;;  %v414_v37 = vpop.f32.mrb[1].mxu1 }
 0x106   : > { %v574_v38 = vpack.c.bf16 %v373_v36, %v371_v34  ;;  %v575_v39 = vpack.c.bf16 %v414_v37, %v412_v35  ;;  %v375_v40 = vpop.f32.mrb[2].mxu0  ;;  %v416_v41 = vpop.f32.mrb[2].mxu1 }
 0x107   : > { %v376_v42 = vpop.f32.mrb[3].mxu0  ;;  %v417_v43 = vpop.f32.mrb[3].mxu1 }
 0x108   : > { %435 = vst [vmem:[%s233_s6] sm:$0xff] %v574_v38  ;;  %436 = vst [vmem:[%s233_s6 + $0x8] sm:$0xff] %v575_v39 }
 0x109 PF: > { %s12_s13 = sadd.s32 1, %s679_s13   ;;  %s786_s9 = smov %s667_s10 }
 0x10a   : > { %p9_p10 = scmp.ge.s32.totalorder %s12_s13, 4   ;;  %s787_s10 = smov %s732_s17 }
 0x10b   : > { %s788_s11 = smov %s675_s12  ;;  %s789_s12 = smov %s791_s14 }
 0x10c   :  { %11 = sbr.rel (!%p9_p10) target bundleno = 3 (0x3), region = 89 }

// kernel: mnist_gen_forward.6
= control target key start
LH: loop header
LB: loop body
LE: loop exit
PB: predicated region body
PF: predicated region fallthrough
CT: control target
= control target key end

     0   :  { %s1877_s15 = smov 0   ;;  %s1879_s16 = smov 0   ;;  %s2369_s0 = inlined_call_operand.vmem [shape: bf16[8,256], index: 0, kind: input, shape index: {}]   ;;  %s2370_s1 = inlined_call_operand.vmem [shape: f32[1,256], index: 1, kind: input, shape index: {}]   ;;  %s2371_s2 = inlined_call_operand.vmem [shape: f32[1,256], index: 2, kind: input, shape index: {}]   ;;  %s2372_s3 = inlined_call_operand.vmem [shape: bf16[256,2048], index: 3, kind: input, shape index: {}]   ;;  %s2373_s4 = inlined_call_operand.vmem [shape: bf16[8,2048], index: 4, kind: output, shape index: {}]  }
   0x1   :  { %s1881_s17 = smov 0   ;;  %s1883_s18 = smov 0  }
   0x2   :  { %s1885_s19 = smov 0  }
   0x3 LB: > { %s23_s20 = sadd.s32 1, %s1846_s18  ;;  %p108_p1 = scmp.ne.s32.totalorder %s1838_s16, %s1834_s15  ;;  %s1850_s19 = sphi %s1885_s19, %s14_s19   ;;  %s1846_s18 = sphi %s1883_s18, %s2377_s18   ;;  %s1842_s17 = sphi %s1881_s17, %s2376_s17   ;;  %s1838_s16 = sphi %s1879_s16, %s2375_s16   ;;  %s1834_s15 = sphi %s1877_s15, %s2374_s15  }
   0x4   : > { %p24_p0 = scmp.ge.s32.totalorder %s23_s20, 2  ;;  %p109_p2 = scmp.eq.s32.totalorder %s1850_s19, 0 }
   0x5   : > { %s101_s22 = sadd.s32 1, %s1838_s16  ;;  %p1625_p5 = scmp.ge.s32.totalorder %s1850_s19, 2 }
   0x6   : > { %s2379_s20 = smov (%p24_p0, %s23_s20), 0  ;;  %p110_p3 = por %p109_p2, %p108_p1 }
   0x7   : > { %s98_s21 = ssub.s32 %s1846_s18, %s2379_s20  ;;  %176 = sbr.rel (%p1625_p5) target bundleno = 82 (0x52), region = 28 }
   0x8   : > { %p99_p4 = scmp.eq.s32.totalorder %s98_s21, 0 }
   0xa   : > { %s1912_s23 = scalar_select %p99_p4, %s1838_s16, %s101_s22  }
   0xe   : > { %179 = sbr.rel (!%p110_p3) target bundleno = 82 (0x52), region = 32  ;;  %s181_s24 = sand.u32 (%p110_p3), 1, %s1838_s16  }
   0xf   : > { %s1767_s25 = sshll.u32 (%p110_p3), %s1846_s18, 5  ;;  %s1626_s26 = sshll.u32 (%p110_p3), %s181_s24, 10 }
  0x10   : > { %s1920_s29 = scalar_lea.vmem (%p110_p3), %s2372_s3, %s1767_s25  ;;  %s1925_s30 = scalar_lea.vmem (%p110_p3), [#allocation2], %s1626_s26 }
  0x11   : > { %v199_v0 = vld [vmem:[%s1920_s29] sm:$0xff] (%p110_p3)  ;;  %v201_v1 = vld [vmem:[%s1920_s29 + $0x8] sm:$0xff] (%p110_p3)  ;;  %v203_v2 = vld [vmem:[%s1920_s29 + $0x10] sm:$0xff] (%p110_p3) }
  0x12   : > { %200 = vst [vmem:[%s1925_s30] sm:$0xff] (%p110_p3), %v199_v0  ;;  %202 = vst [vmem:[%s1925_s30 + $0x8] sm:$0xff] (%p110_p3), %v201_v1  ;;  %v205_v3 = vld [vmem:[%s1920_s29 + $0x18] sm:$0xff] (%p110_p3)  ;;  %v207_v4 = vld [vmem:[%s1920_s29 + $0x40] sm:$0xff] (%p110_p3) }
  0x13   : > { %204 = vst [vmem:[%s1925_s30 + $0x10] sm:$0xff] (%p110_p3), %v203_v2  ;;  %v209_v5 = vld [vmem:[%s1920_s29 + $0x48] sm:$0xff] (%p110_p3)  ;;  %206 = vst [vmem:[%s1925_s30 + $0x18] sm:$0xff] (%p110_p3), %v205_v3  ;;  %v211_v6 = vld [vmem:[%s1920_s29 + $0x50] sm:$0xff] (%p110_p3) }
  0x14   : > { %208 = vst [vmem:[%s1925_s30 + $0x20] sm:$0xff] (%p110_p3), %v207_v4  ;;  %210 = vst [vmem:[%s1925_s30 + $0x28] sm:$0xff] (%p110_p3), %v209_v5  ;;  %v213_v7 = vld [vmem:[%s1920_s29 + $0x58] sm:$0xff] (%p110_p3)  ;;  %v215_v8 = vld [vmem:[%s1920_s29 + $0x80] sm:$0xff] (%p110_p3) }
  0x15   : > { %212 = vst [vmem:[%s1925_s30 + $0x30] sm:$0xff] %v211_v6  ;;  %214 = vst [vmem:[%s1925_s30 + $0x38] sm:$0xff] %v213_v7  ;;  %v217_v9 = vld [vmem:[%s1920_s29 + $0x88] sm:$0xff]  ;;  %v219_v10 = vld [vmem:[%s1920_s29 + $0x90] sm:$0xff] }
  0x16   : > { %216 = vst [vmem:[%s1925_s30 + $0x40] sm:$0xff] %v215_v8  ;;  %v221_v11 = vld [vmem:[%s1920_s29 + $0x98] sm:$0xff]  ;;  %218 = vst [vmem:[%s1925_s30 + $0x48] sm:$0xff] %v217_v9  ;;  %v223_v12 = vld [vmem:[%s1920_s29 + $0xc0] sm:$0xff] }
  0x17   : > { %220 = vst [vmem:[%s1925_s30 + $0x50] sm:$0xff] %v219_v10  ;;  %222 = vst [vmem:[%s1925_s30 + $0x58] sm:$0xff] %v221_v11  ;;  %v225_v13 = vld [vmem:[%s1920_s29 + $0xc8] sm:$0xff]  ;;  %v227_v14 = vld [vmem:[%s1920_s29 + $0xd0] sm:$0xff] }
  0x18   : > { %224 = vst [vmem:[%s1925_s30 + $0x60] sm:$0xff] %v223_v12  ;;  %226 = vst [vmem:[%s1925_s30 + $0x68] sm:$0xff] %v225_v13  ;;  %v229_v15 = vld [vmem:[%s1920_s29 + $0xd8] sm:$0xff]  ;;  %v231_v16 = vld [vmem:[%s1920_s29 + $0x100] sm:$0xff] }
  0x19   : > { %228 = vst [vmem:[%s1925_s30 + $0x70] sm:$0xff] %v227_v14  ;;  %v233_v17 = vld [vmem:[%s1920_s29 + $0x108] sm:$0xff]  ;;  %230 = vst [vmem:[%s1925_s30 + $0x78] sm:$0xff] %v229_v15  ;;  %v235_v18 = vld [vmem:[%s1920_s29 + $0x110] sm:$0xff] }
  0x1a   : > { %232 = vst [vmem:[%s1925_s30 + $0x80] sm:$0xff] %v231_v16  ;;  %234 = vst [vmem:[%s1925_s30 + $0x88] sm:$0xff] %v233_v17  ;;  %v237_v19 = vld [vmem:[%s1920_s29 + $0x118] sm:$0xff]  ;;  %v239_v20 = vld [vmem:[%s1920_s29 + $0x140] sm:$0xff] }
  0x1b   : > { %236 = vst [vmem:[%s1925_s30 + $0x90] sm:$0xff] %v235_v18  ;;  %238 = vst [vmem:[%s1925_s30 + $0x98] sm:$0xff] %v237_v19  ;;  %v241_v21 = vld [vmem:[%s1920_s29 + $0x148] sm:$0xff]  ;;  %v243_v22 = vld [vmem:[%s1920_s29 + $0x150] sm:$0xff] }
  0x1c   : > { %240 = vst [vmem:[%s1925_s30 + $0xa0] sm:$0xff] %v239_v20  ;;  %v245_v23 = vld [vmem:[%s1920_s29 + $0x158] sm:$0xff]  ;;  %242 = vst [vmem:[%s1925_s30 + $0xa8] sm:$0xff] %v241_v21  ;;  %v247_v24 = vld [vmem:[%s1920_s29 + $0x180] sm:$0xff] }
  0x1d   : > { %244 = vst [vmem:[%s1925_s30 + $0xb0] sm:$0xff] %v243_v22  ;;  %246 = vst [vmem:[%s1925_s30 + $0xb8] sm:$0xff] %v245_v23  ;;  %v249_v25 = vld [vmem:[%s1920_s29 + $0x188] sm:$0xff]  ;;  %v251_v26 = vld [vmem:[%s1920_s29 + $0x190] sm:$0xff] }
  0x1e   : > { %248 = vst [vmem:[%s1925_s30 + $0xc0] sm:$0xff] %v247_v24  ;;  %250 = vst [vmem:[%s1925_s30 + $0xc8] sm:$0xff] %v249_v25  ;;  %v253_v27 = vld [vmem:[%s1920_s29 + $0x198] sm:$0xff]  ;;  %v255_v28 = vld [vmem:[%s1920_s29 + $0x1c0] sm:$0xff] }
  0x1f   : > { %252 = vst [vmem:[%s1925_s30 + $0xd0] sm:$0xff] %v251_v26  ;;  %v257_v29 = vld [vmem:[%s1920_s29 + $0x1c8] sm:$0xff]  ;;  %254 = vst [vmem:[%s1925_s30 + $0xd8] sm:$0xff] %v253_v27  ;;  %v259_v30 = vld [vmem:[%s1920_s29 + $0x1d0] sm:$0xff] }
  0x20   : > { %256 = vst [vmem:[%s1925_s30 + $0xe0] sm:$0xff] %v255_v28  ;;  %258 = vst [vmem:[%s1925_s30 + $0xe8] sm:$0xff] %v257_v29  ;;  %v261_v31 = vld [vmem:[%s1920_s29 + $0x1d8] sm:$0xff]  ;;  %v263_v32 = vld [vmem:[%s1920_s29 + $0x200] sm:$0xff] }
  0x21   : > { %260 = vst [vmem:[%s1925_s30 + $0xf0] sm:$0xff] %v259_v30  ;;  %262 = vst [vmem:[%s1925_s30 + $0xf8] sm:$0xff] %v261_v31  ;;  %v265_v33 = vld [vmem:[%s1920_s29 + $0x208] sm:$0xff]  ;;  %v267_v34 = vld [vmem:[%s1920_s29 + $0x210] sm:$0xff] }
  0x22   : > { %264 = vst [vmem:[%s1925_s30 + $0x100] sm:$0xff] %v263_v32  ;;  %v269_v35 = vld [vmem:[%s1920_s29 + $0x218] sm:$0xff]  ;;  %266 = vst [vmem:[%s1925_s30 + $0x108] sm:$0xff] %v265_v33  ;;  %v271_v36 = vld [vmem:[%s1920_s29 + $0x240] sm:$0xff] }
  0x23   : > { %268 = vst [vmem:[%s1925_s30 + $0x110] sm:$0xff] %v267_v34  ;;  %270 = vst [vmem:[%s1925_s30 + $0x118] sm:$0xff] %v269_v35  ;;  %v273_v37 = vld [vmem:[%s1920_s29 + $0x248] sm:$0xff]  ;;  %v275_v38 = vld [vmem:[%s1920_s29 + $0x250] sm:$0xff] }
  0x24   : > { %272 = vst [vmem:[%s1925_s30 + $0x120] sm:$0xff] %v271_v36  ;;  %274 = vst [vmem:[%s1925_s30 + $0x128] sm:$0xff] %v273_v37  ;;  %v277_v39 = vld [vmem:[%s1920_s29 + $0x258] sm:$0xff]  ;;  %v279_v40 = vld [vmem:[%s1920_s29 + $0x280] sm:$0xff] }
  0x25   : > { %276 = vst [vmem:[%s1925_s30 + $0x130] sm:$0xff] %v275_v38  ;;  %v281_v41 = vld [vmem:[%s1920_s29 + $0x288] sm:$0xff]  ;;  %278 = vst [vmem:[%s1925_s30 + $0x138] sm:$0xff] %v277_v39  ;;  %v283_v42 = vld [vmem:[%s1920_s29 + $0x290] sm:$0xff] }
  0x26   : > { %280 = vst [vmem:[%s1925_s30 + $0x140] sm:$0xff] %v279_v40  ;;  %282 = vst [vmem:[%s1925_s30 + $0x148] sm:$0xff] %v281_v41  ;;  %v285_v43 = vld [vmem:[%s1920_s29 + $0x298] sm:$0xff]  ;;  %v287_v44 = vld [vmem:[%s1920_s29 + $0x2c0] sm:$0xff] }
  0x27   : > { %284 = vst [vmem:[%s1925_s30 + $0x150] sm:$0xff] %v283_v42  ;;  %286 = vst [vmem:[%s1925_s30 + $0x158] sm:$0xff] %v285_v43  ;;  %v289_v45 = vld [vmem:[%s1920_s29 + $0x2c8] sm:$0xff]  ;;  %v291_v46 = vld [vmem:[%s1920_s29 + $0x2d0] sm:$0xff] }
  0x28   : > { %288 = vst [vmem:[%s1925_s30 + $0x160] sm:$0xff] %v287_v44  ;;  %v293_v47 = vld [vmem:[%s1920_s29 + $0x2d8] sm:$0xff]  ;;  %290 = vst [vmem:[%s1925_s30 + $0x168] sm:$0xff] %v289_v45  ;;  %v295_v48 = vld [vmem:[%s1920_s29 + $0x300] sm:$0xff] }
  0x29   : > { %292 = vst [vmem:[%s1925_s30 + $0x170] sm:$0xff] %v291_v46  ;;  %294 = vst [vmem:[%s1925_s30 + $0x178] sm:$0xff] %v293_v47  ;;  %v297_v49 = vld [vmem:[%s1920_s29 + $0x308] sm:$0xff]  ;;  %v299_v50 = vld [vmem:[%s1920_s29 + $0x310] sm:$0xff] }
  0x2a   : > { %296 = vst [vmem:[%s1925_s30 + $0x180] sm:$0xff] %v295_v48  ;;  %298 = vst [vmem:[%s1925_s30 + $0x188] sm:$0xff] %v297_v49  ;;  %v301_v51 = vld [vmem:[%s1920_s29 + $0x318] sm:$0xff]  ;;  %v303_v52 = vld [vmem:[%s1920_s29 + $0x340] sm:$0xff] }
  0x2b   : > { %300 = vst [vmem:[%s1925_s30 + $0x190] sm:$0xff] %v299_v50  ;;  %v305_v53 = vld [vmem:[%s1920_s29 + $0x348] sm:$0xff]  ;;  %302 = vst [vmem:[%s1925_s30 + $0x198] sm:$0xff] %v301_v51  ;;  %v307_v54 = vld [vmem:[%s1920_s29 + $0x350] sm:$0xff] }
  0x2c   : > { %304 = vst [vmem:[%s1925_s30 + $0x1a0] sm:$0xff] %v303_v52  ;;  %306 = vst [vmem:[%s1925_s30 + $0x1a8] sm:$0xff] %v305_v53  ;;  %v309_v55 = vld [vmem:[%s1920_s29 + $0x358] sm:$0xff]  ;;  %v311_v56 = vld [vmem:[%s1920_s29 + $0x380] sm:$0xff] }
  0x2d   : > { %308 = vst [vmem:[%s1925_s30 + $0x1b0] sm:$0xff] %v307_v54  ;;  %310 = vst [vmem:[%s1925_s30 + $0x1b8] sm:$0xff] %v309_v55  ;;  %v313_v57 = vld [vmem:[%s1920_s29 + $0x388] sm:$0xff]  ;;  %v315_v58 = vld [vmem:[%s1920_s29 + $0x390] sm:$0xff] }
  0x2e   : > { %312 = vst [vmem:[%s1925_s30 + $0x1c0] sm:$0xff] %v311_v56  ;;  %v317_v59 = vld [vmem:[%s1920_s29 + $0x398] sm:$0xff]  ;;  %314 = vst [vmem:[%s1925_s30 + $0x1c8] sm:$0xff] %v313_v57  ;;  %v319_v60 = vld [vmem:[%s1920_s29 + $0x3c0] sm:$0xff] }
  0x2f   : > { %316 = vst [vmem:[%s1925_s30 + $0x1d0] sm:$0xff] %v315_v58  ;;  %318 = vst [vmem:[%s1925_s30 + $0x1d8] sm:$0xff] %v317_v59  ;;  %v321_v61 = vld [vmem:[%s1920_s29 + $0x3c8] sm:$0xff]  ;;  %v323_v62 = vld [vmem:[%s1920_s29 + $0x3d0] sm:$0xff] }
  0x30   : > { %320 = vst [vmem:[%s1925_s30 + $0x1e0] sm:$0xff] %v319_v60  ;;  %322 = vst [vmem:[%s1925_s30 + $0x1e8] sm:$0xff] %v321_v61  ;;  %v325_v63 = vld [vmem:[%s1920_s29 + $0x3d8] sm:$0xff]  ;;  %v327_v0 = vld [vmem:[%s1920_s29 + $0x400] sm:$0xff] }
  0x31   : > { %324 = vst [vmem:[%s1925_s30 + $0x1f0] sm:$0xff] %v323_v62  ;;  %v329_v1 = vld [vmem:[%s1920_s29 + $0x408] sm:$0xff]  ;;  %326 = vst [vmem:[%s1925_s30 + $0x1f8] sm:$0xff] %v325_v63  ;;  %v331_v2 = vld [vmem:[%s1920_s29 + $0x410] sm:$0xff] }
  0x32   : > { %328 = vst [vmem:[%s1925_s30 + $0x200] sm:$0xff] %v327_v0  ;;  %330 = vst [vmem:[%s1925_s30 + $0x208] sm:$0xff] %v329_v1  ;;  %v333_v3 = vld [vmem:[%s1920_s29 + $0x418] sm:$0xff]  ;;  %v335_v4 = vld [vmem:[%s1920_s29 + $0x440] sm:$0xff] }
  0x33   : > { %332 = vst [vmem:[%s1925_s30 + $0x210] sm:$0xff] %v331_v2  ;;  %334 = vst [vmem:[%s1925_s30 + $0x218] sm:$0xff] %v333_v3  ;;  %v337_v5 = vld [vmem:[%s1920_s29 + $0x448] sm:$0xff]  ;;  %v339_v6 = vld [vmem:[%s1920_s29 + $0x450] sm:$0xff] }
  0x34   : > { %336 = vst [vmem:[%s1925_s30 + $0x220] sm:$0xff] %v335_v4  ;;  %v341_v7 = vld [vmem:[%s1920_s29 + $0x458] sm:$0xff]  ;;  %338 = vst [vmem:[%s1925_s30 + $0x228] sm:$0xff] %v337_v5  ;;  %v343_v8 = vld [vmem:[%s1920_s29 + $0x480] sm:$0xff] }
  0x35   : > { %340 = vst [vmem:[%s1925_s30 + $0x230] sm:$0xff] %v339_v6  ;;  %342 = vst [vmem:[%s1925_s30 + $0x238] sm:$0xff] %v341_v7  ;;  %v345_v9 = vld [vmem:[%s1920_s29 + $0x488] sm:$0xff]  ;;  %v347_v10 = vld [vmem:[%s1920_s29 + $0x490] sm:$0xff] }
  0x36   : > { %344 = vst [vmem:[%s1925_s30 + $0x240] sm:$0xff] %v343_v8  ;;  %346 = vst [vmem:[%s1925_s30 + $0x248] sm:$0xff] %v345_v9  ;;  %v349_v11 = vld [vmem:[%s1920_s29 + $0x498] sm:$0xff]  ;;  %v351_v12 = vld [vmem:[%s1920_s29 + $0x4c0] sm:$0xff] }
  0x37   : > { %348 = vst [vmem:[%s1925_s30 + $0x250] sm:$0xff] %v347_v10  ;;  %v353_v13 = vld [vmem:[%s1920_s29 + $0x4c8] sm:$0xff]  ;;  %350 = vst [vmem:[%s1925_s30 + $0x258] sm:$0xff] %v349_v11  ;;  %v355_v14 = vld [vmem:[%s1920_s29 + $0x4d0] sm:$0xff] }
  0x38   : > { %352 = vst [vmem:[%s1925_s30 + $0x260] sm:$0xff] %v351_v12  ;;  %354 = vst [vmem:[%s1925_s30 + $0x268] sm:$0xff] %v353_v13  ;;  %v357_v15 = vld [vmem:[%s1920_s29 + $0x4d8] sm:$0xff]  ;;  %v359_v16 = vld [vmem:[%s1920_s29 + $0x500] sm:$0xff] }
  0x39   : > { %356 = vst [vmem:[%s1925_s30 + $0x270] sm:$0xff] %v355_v14  ;;  %358 = vst [vmem:[%s1925_s30 + $0x278] sm:$0xff] %v357_v15  ;;  %v361_v17 = vld [vmem:[%s1920_s29 + $0x508] sm:$0xff]  ;;  %v363_v18 = vld [vmem:[%s1920_s29 + $0x510] sm:$0xff] }
  0x3a   : > { %360 = vst [vmem:[%s1925_s30 + $0x280] sm:$0xff] %v359_v16  ;;  %v365_v19 = vld [vmem:[%s1920_s29 + $0x518] sm:$0xff]  ;;  %362 = vst [vmem:[%s1925_s30 + $0x288] sm:$0xff] %v361_v17  ;;  %v367_v20 = vld [vmem:[%s1920_s29 + $0x540] sm:$0xff] }
  0x3b   : > { %364 = vst [vmem:[%s1925_s30 + $0x290] sm:$0xff] %v363_v18  ;;  %366 = vst [vmem:[%s1925_s30 + $0x298] sm:$0xff] %v365_v19  ;;  %v369_v21 = vld [vmem:[%s1920_s29 + $0x548] sm:$0xff]  ;;  %v371_v22 = vld [vmem:[%s1920_s29 + $0x550] sm:$0xff] }
  0x3c   : > { %368 = vst [vmem:[%s1925_s30 + $0x2a0] sm:$0xff] %v367_v20  ;;  %370 = vst [vmem:[%s1925_s30 + $0x2a8] sm:$0xff] %v369_v21  ;;  %v373_v23 = vld [vmem:[%s1920_s29 + $0x558] sm:$0xff]  ;;  %v375_v24 = vld [vmem:[%s1920_s29 + $0x580] sm:$0xff] }
  0x3d   : > { %372 = vst [vmem:[%s1925_s30 + $0x2b0] sm:$0xff] %v371_v22  ;;  %v377_v25 = vld [vmem:[%s1920_s29 + $0x588] sm:$0xff]  ;;  %374 = vst [vmem:[%s1925_s30 + $0x2b8] sm:$0xff] %v373_v23  ;;  %v379_v26 = vld [vmem:[%s1920_s29 + $0x590] sm:$0xff] }
  0x3e   : > { %376 = vst [vmem:[%s1925_s30 + $0x2c0] sm:$0xff] %v375_v24  ;;  %378 = vst [vmem:[%s1925_s30 + $0x2c8] sm:$0xff] %v377_v25  ;;  %v381_v27 = vld [vmem:[%s1920_s29 + $0x598] sm:$0xff]  ;;  %v383_v28 = vld [vmem:[%s1920_s29 + $0x5c0] sm:$0xff] }
  0x3f   : > { %380 = vst [vmem:[%s1925_s30 + $0x2d0] sm:$0xff] %v379_v26  ;;  %382 = vst [vmem:[%s1925_s30 + $0x2d8] sm:$0xff] %v381_v27  ;;  %v385_v29 = vld [vmem:[%s1920_s29 + $0x5c8] sm:$0xff]  ;;  %v387_v30 = vld [vmem:[%s1920_s29 + $0x5d0] sm:$0xff] }
  0x40   : > { %384 = vst [vmem:[%s1925_s30 + $0x2e0] sm:$0xff] %v383_v28  ;;  %v389_v31 = vld [vmem:[%s1920_s29 + $0x5d8] sm:$0xff]  ;;  %386 = vst [vmem:[%s1925_s30 + $0x2e8] sm:$0xff] %v385_v29  ;;  %v391_v32 = vld [vmem:[%s1920_s29 + $0x600] sm:$0xff] }
  0x41   : > { %388 = vst [vmem:[%s1925_s30 + $0x2f0] sm:$0xff] %v387_v30  ;;  %390 = vst [vmem:[%s1925_s30 + $0x2f8] sm:$0xff] %v389_v31  ;;  %v393_v33 = vld [vmem:[%s1920_s29 + $0x608] sm:$0xff]  ;;  %v395_v34 = vld [vmem:[%s1920_s29 + $0x610] sm:$0xff] }
  0x42   : > { %392 = vst [vmem:[%s1925_s30 + $0x300] sm:$0xff] %v391_v32  ;;  %394 = vst [vmem:[%s1925_s30 + $0x308] sm:$0xff] %v393_v33  ;;  %v397_v35 = vld [vmem:[%s1920_s29 + $0x618] sm:$0xff]  ;;  %v399_v36 = vld [vmem:[%s1920_s29 + $0x640] sm:$0xff] }
  0x43   : > { %396 = vst [vmem:[%s1925_s30 + $0x310] sm:$0xff] %v395_v34  ;;  %v401_v37 = vld [vmem:[%s1920_s29 + $0x648] sm:$0xff]  ;;  %398 = vst [vmem:[%s1925_s30 + $0x318] sm:$0xff] %v397_v35  ;;  %v403_v38 = vld [vmem:[%s1920_s29 + $0x650] sm:$0xff] }
  0x44   : > { %400 = vst [vmem:[%s1925_s30 + $0x320] sm:$0xff] %v399_v36  ;;  %402 = vst [vmem:[%s1925_s30 + $0x328] sm:$0xff] %v401_v37  ;;  %v405_v39 = vld [vmem:[%s1920_s29 + $0x658] sm:$0xff]  ;;  %v407_v40 = vld [vmem:[%s1920_s29 + $0x680] sm:$0xff] }
  0x45   : > { %404 = vst [vmem:[%s1925_s30 + $0x330] sm:$0xff] %v403_v38  ;;  %406 = vst [vmem:[%s1925_s30 + $0x338] sm:$0xff] %v405_v39  ;;  %v409_v41 = vld [vmem:[%s1920_s29 + $0x688] sm:$0xff]  ;;  %v411_v42 = vld [vmem:[%s1920_s29 + $0x690] sm:$0xff] }
  0x46   : > { %408 = vst [vmem:[%s1925_s30 + $0x340] sm:$0xff] %v407_v40  ;;  %v413_v43 = vld [vmem:[%s1920_s29 + $0x698] sm:$0xff]  ;;  %410 = vst [vmem:[%s1925_s30 + $0x348] sm:$0xff] %v409_v41  ;;  %v415_v44 = vld [vmem:[%s1920_s29 + $0x6c0] sm:$0xff] }
  0x47   : > { %412 = vst [vmem:[%s1925_s30 + $0x350] sm:$0xff] %v411_v42  ;;  %414 = vst [vmem:[%s1925_s30 + $0x358] sm:$0xff] %v413_v43  ;;  %v417_v45 = vld [vmem:[%s1920_s29 + $0x6c8] sm:$0xff]  ;;  %v419_v46 = vld [vmem:[%s1920_s29 + $0x6d0] sm:$0xff] }
  0x48   : > { %416 = vst [vmem:[%s1925_s30 + $0x360] sm:$0xff] %v415_v44  ;;  %418 = vst [vmem:[%s1925_s30 + $0x368] sm:$0xff] %v417_v45  ;;  %v421_v47 = vld [vmem:[%s1920_s29 + $0x6d8] sm:$0xff]  ;;  %v423_v48 = vld [vmem:[%s1920_s29 + $0x700] sm:$0xff] }
  0x49   : > { %420 = vst [vmem:[%s1925_s30 + $0x370] sm:$0xff] %v419_v46  ;;  %v425_v49 = vld [vmem:[%s1920_s29 + $0x708] sm:$0xff]  ;;  %422 = vst [vmem:[%s1925_s30 + $0x378] sm:$0xff] %v421_v47  ;;  %v427_v50 = vld [vmem:[%s1920_s29 + $0x710] sm:$0xff] }
  0x4a   : > { %424 = vst [vmem:[%s1925_s30 + $0x380] sm:$0xff] %v423_v48  ;;  %426 = vst [vmem:[%s1925_s30 + $0x388] sm:$0xff] %v425_v49  ;;  %v429_v51 = vld [vmem:[%s1920_s29 + $0x718] sm:$0xff]  ;;  %v431_v52 = vld [vmem:[%s1920_s29 + $0x740] sm:$0xff] }
  0x4b   : > { %428 = vst [vmem:[%s1925_s30 + $0x390] sm:$0xff] %v427_v50  ;;  %430 = vst [vmem:[%s1925_s30 + $0x398] sm:$0xff] %v429_v51  ;;  %v433_v53 = vld [vmem:[%s1920_s29 + $0x748] sm:$0xff]  ;;  %v435_v54 = vld [vmem:[%s1920_s29 + $0x750] sm:$0xff] }
  0x4c   : > { %432 = vst [vmem:[%s1925_s30 + $0x3a0] sm:$0xff] %v431_v52  ;;  %v437_v55 = vld [vmem:[%s1920_s29 + $0x758] sm:$0xff]  ;;  %434 = vst [vmem:[%s1925_s30 + $0x3a8] sm:$0xff] %v433_v53  ;;  %v439_v56 = vld [vmem:[%s1920_s29 + $0x780] sm:$0xff] }
  0x4d   : > { %436 = vst [vmem:[%s1925_s30 + $0x3b0] sm:$0xff] %v435_v54  ;;  %438 = vst [vmem:[%s1925_s30 + $0x3b8] sm:$0xff] %v437_v55  ;;  %v441_v57 = vld [vmem:[%s1920_s29 + $0x788] sm:$0xff]  ;;  %v443_v58 = vld [vmem:[%s1920_s29 + $0x790] sm:$0xff] }
  0x4e   : > { %440 = vst [vmem:[%s1925_s30 + $0x3c0] sm:$0xff] %v439_v56  ;;  %442 = vst [vmem:[%s1925_s30 + $0x3c8] sm:$0xff] %v441_v57  ;;  %v445_v59 = vld [vmem:[%s1920_s29 + $0x798] sm:$0xff]  ;;  %v447_v60 = vld [vmem:[%s1920_s29 + $0x7c0] sm:$0xff] }
  0x4f   : > { %444 = vst [vmem:[%s1925_s30 + $0x3d0] sm:$0xff] %v443_v58  ;;  %v449_v61 = vld [vmem:[%s1920_s29 + $0x7c8] sm:$0xff]  ;;  %446 = vst [vmem:[%s1925_s30 + $0x3d8] sm:$0xff] %v445_v59  ;;  %v451_v62 = vld [vmem:[%s1920_s29 + $0x7d0] sm:$0xff] }
  0x50   : > { %448 = vst [vmem:[%s1925_s30 + $0x3e0] sm:$0xff] %v447_v60  ;;  %450 = vst [vmem:[%s1925_s30 + $0x3e8] sm:$0xff] %v449_v61  ;;  %v453_v63 = vld [vmem:[%s1920_s29 + $0x7d8] sm:$0xff] }
  0x51   : > { %452 = vst [vmem:[%s1925_s30 + $0x3f0] sm:$0xff] %v451_v62  ;;  %454 = vst [vmem:[%s1925_s30 + $0x3f8] sm:$0xff] %v453_v63 }
  0x52 PF: > { %p1629_p6 = scmp.ge.s32.totalorder %s1850_s19, 1  ;;  %p459_p7 = scmp.lt.s32.totalorder %s1850_s19, 3 }
  0x54   : > { %p460_p8 = pnand %p1629_p6, %p459_p7 }
  0x55   : > { %s466_s5 = sand.u32 (!%p460_p8), 1, %s1834_s15   ;;  %v521_v0 = vlaneseq (!%p460_p8)  ;;  %v2186_v1 = vld [vmem:[%s2369_s0] sm:$0xff] (!%p460_p8)  ;;  %s1631_s14 = sshll.u32 (!%p460_p8), %s1842_s17, 3 }
  0x56   : > { %463 = sbr.rel (%p460_p8) target bundleno = 436 (0x1b4), region = 55  ;;  %s1630_s6 = sshll.u32 (!%p460_p8), %s466_s5, 10  ;;  %v2191_v2 = vld [vmem:[%s2370_s1] sm:$0x3] (!%p460_p8)  ;;  %v518_v24 = vunpack.c.h.bf16 (!%p460_p8), %v2186_v1 }
  0x57   : > { %v2193_v3 = vshrl.u32 (!%p460_p8), %v521_v0, 7  ;;  %s2195_s11 = scalar_lea.vmem (!%p460_p8), [#allocation2], %s1630_s6  ;;  %v2203_v7 = vld [vmem:[%s2371_s2] sm:$0x3] (!%p460_p8)  ;;  %p509_p9 = scmp.lt.s32.totalorder (!%p460_p8), %s1631_s14, 15 }
  0x58   : > { %v551_v4 = vld [vmem:[%s2195_s11] sm:$0xff] (!%p460_p8)  ;;  %v552_v6 = vld [vmem:[%s2195_s11 + $0x8] sm:$0xff] (!%p460_p8) }
  0x59   : > { %v555_v5 = vld [vmem:[%s2195_s11 + $0x20] sm:$0xff] (!%p460_p8)  ;;  %v556_v9 = vld [vmem:[%s2195_s11 + $0x28] sm:$0xff] (!%p460_p8)  ;;  %v527_v13 = vsub.s32 (!%p460_p8), 1, %v2193_v3 }
  0x5a   : > { %v1634_v8 = vcombine.high (!%p460_p8), %v551_v4, %v555_v5  ;;  %v1633_v10 = vcombine.low (!%p460_p8), %v551_v4, %v555_v5  ;;  %v559_v11 = vld [vmem:[%s2195_s11 + $0x40] sm:$0xff] (!%p460_p8)  ;;  %v1636_v14 = vcombine.high (!%p460_p8), %v552_v6, %v556_v9  ;;  %v1635_v15 = vcombine.low (!%p460_p8), %v552_v6, %v556_v9  ;;  %v560_v17 = vld [vmem:[%s2195_s11 + $0x48] sm:$0xff] (!%p460_p8) }
  0x5b   : > { %v563_v12 = vld [vmem:[%s2195_s11 + $0x60] sm:$0xff] (!%p460_p8)  ;;  %v564_v18 = vld [vmem:[%s2195_s11 + $0x68] sm:$0xff] (!%p460_p8)  ;;  %v528_v25 = vrot.slane (!%p460_p8), %v2191_v2, %v527_v13  ;;  %v542_v29 = vrot.slane (!%p460_p8), %v2203_v7, %v527_v13 }
  0x5c   : > { %v1642_v16 = vcombine.high (!%p460_p8), %v559_v11, %v563_v12  ;;  %v567_v19 = vld [vmem:[%s2195_s11 + $0x80] sm:$0xff] (!%p460_p8)  ;;  %1319 = vmatprep.subr.bf16.mxu0 (!%p460_p8), %v1634_v8  ;;  %v1644_v20 = vcombine.high (!%p460_p8), %v560_v17, %v564_v18  ;;  %v568_v22 = vld [vmem:[%s2195_s11 + $0x88] sm:$0xff] (!%p460_p8)  ;;  %1360 = vmatprep.subr.bf16.mxu1 (!%p460_p8), %v1636_v14  ;;  %v1641_v26 = vcombine.low (!%p460_p8), %v559_v11, %v563_v12 }
  0x5d   : > { %v571_v21 = vld [vmem:[%s2195_s11 + $0xa0] sm:$0xff]  ;;  %v572_v23 = vld [vmem:[%s2195_s11 + $0xa8] sm:$0xff]  ;;  %1320 = vmatpush1.bf16.msra.mxu0 %v1633_v10  ;;  %1361 = vmatpush1.bf16.msra.mxu1 %v1635_v15  ;;  %v1643_v27 = vcombine.low %v560_v17, %v564_v18  ;;  %v532_v35 = vmul.f32 %v528_v25, %v518_v24  ;;  %s2381_s14 = smov (!%p509_p9, %s1631_s14), 15 }
  0x5e   : > { %1321 = vmatprep.subr.bf16.mxu0 %v1642_v16  ;;  %v1650_v28 = vcombine.high %v567_v19, %v571_v21  ;;  %1362 = vmatprep.subr.bf16.mxu1 %v1644_v20  ;;  %v1652_v30 = vcombine.high %v568_v22, %v572_v23  ;;  %v575_v31 = vld [vmem:[%s2195_s11 + $0xc0] sm:$0xff]  ;;  %v576_v33 = vld [vmem:[%s2195_s11 + $0xc8] sm:$0xff]  ;;  %v1649_v36 = vcombine.low %v567_v19, %v571_v21  ;;  %s1632_s15 = sshll.u32 %s2381_s14, 2 }
  0x5f   : > { %v579_v32 = vld [vmem:[%s2195_s11 + $0xe0] sm:$0xff]  ;;  %v580_v34 = vld [vmem:[%s2195_s11 + $0xe8] sm:$0xff]  ;;  %v1651_v37 = vcombine.low %v568_v22, %v572_v23  ;;  %v546_v39 = vadd.f32 %v542_v29, %v532_v35  ;;  %s514_s24 = scalar_lea.vmem %s2373_s4, %s1632_s15 }
  0x60   : > { %v1658_v38 = vcombine.high %v575_v31, %v579_v32  ;;  %v1660_v40 = vcombine.high %v576_v33, %v580_v34  ;;  %v583_v41 = vld [vmem:[%s2195_s11 + $0x100] sm:$0xff]  ;;  %v584_v43 = vld [vmem:[%s2195_s11 + $0x108] sm:$0xff]  ;;  %v1657_v46 = vcombine.low %v575_v31, %v579_v32  ;;  %v1659_v47 = vcombine.low %v576_v33, %v580_v34 }
  0x61   : > { %1322 = vmatpush1.bf16.msra.mxu0 %v1641_v26  ;;  %1363 = vmatpush1.bf16.msra.mxu1 %v1643_v27  ;;  %v587_v42 = vld [vmem:[%s2195_s11 + $0x120] sm:$0xff]  ;;  %v588_v44 = vld [vmem:[%s2195_s11 + $0x128] sm:$0xff]  ;;  %v548_v45 = vmax.f32 %v546_v39, 0.0 }
  0x62   : > { %1323 = vmatprep.subr.bf16.mxu0 %v1650_v28  ;;  %1364 = vmatprep.subr.bf16.mxu1 %v1652_v30  ;;  %v1666_v48 = vcombine.high %v583_v41, %v587_v42  ;;  %v1668_v50 = vcombine.high %v584_v43, %v588_v44  ;;  %v591_v51 = vld [vmem:[%s2195_s11 + $0x140] sm:$0xff]  ;;  %v592_v53 = vld [vmem:[%s2195_s11 + $0x148] sm:$0xff]  ;;  %v1665_v55 = vcombine.low %v583_v41, %v587_v42 }
  0x63   : > { %v2226_v49 = vpack.c.bf16 %v548_v45, %v548_v45  ;;  %v595_v52 = vld [vmem:[%s2195_s11 + $0x160] sm:$0xff]  ;;  %v596_v54 = vld [vmem:[%s2195_s11 + $0x168] sm:$0xff]  ;;  %v1667_v56 = vcombine.low %v584_v43, %v588_v44 }
  0x64   : > { %v1674_v57 = vcombine.high %v591_v51, %v595_v52  ;;  %v1676_v58 = vcombine.high %v592_v53, %v596_v54  ;;  %v599_v59 = vld [vmem:[%s2195_s11 + $0x180] sm:$0xff]  ;;  %v600_v61 = vld [vmem:[%s2195_s11 + $0x188] sm:$0xff]  ;;  %v1673_v63 = vcombine.low %v591_v51, %v595_v52  ;;  %v1675_v0 = vcombine.low %v592_v53, %v596_v54 }
  0x65   : > { %1324 = vmatpush1.bf16.msra.mxu0 %v1649_v36  ;;  %1365 = vmatpush1.bf16.msra.mxu1 %v1651_v37  ;;  %v603_v60 = vld [vmem:[%s2195_s11 + $0x1a0] sm:$0xff]  ;;  %v604_v62 = vld [vmem:[%s2195_s11 + $0x1a8] sm:$0xff]  ;;  %v523_v52 = vsub.s32 0, %v2193_v3 }
  0x66   : > { %1325 = vmatprep.subr.bf16.mxu0 %v1658_v38  ;;  %1366 = vmatprep.subr.bf16.mxu1 %v1660_v40  ;;  %v1682_v4 = vcombine.high %v599_v59, %v603_v60  ;;  %v1684_v5 = vcombine.high %v600_v61, %v604_v62  ;;  %v607_v6 = vld [vmem:[%s2195_s11 + $0x1c0] sm:$0xff]  ;;  %v608_v9 = vld [vmem:[%s2195_s11 + $0x1c8] sm:$0xff]  ;;  %v1681_v11 = vcombine.low %v599_v59, %v603_v60 }
  0x67   : > { %1351 = vmatprep.mubr.bf16.mxu0 %v2226_v49  ;;  %1392 = vmatprep.mubr.bf16.mxu1 %v2226_v49  ;;  %v611_v8 = vld [vmem:[%s2195_s11 + $0x1e0] sm:$0xff]  ;;  %v612_v10 = vld [vmem:[%s2195_s11 + $0x1e8] sm:$0xff]  ;;  %v1683_v12 = vcombine.low %v600_v61, %v604_v62  ;;  %v517_v61 = vunpack.c.l.bf16 %v2186_v1  ;;  %v524_v3 = vrot.slane %v2191_v2, %v523_v52  ;;  %v538_v1 = vrot.slane %v2203_v7, %v523_v52  ;;  %v582_v52 = vld [vmem:[%s2195_s11 + $0xf8] sm:$0xff] }
  0x68   : > { %v1690_v13 = vcombine.high %v607_v6, %v611_v8  ;;  %v1692_v14 = vcombine.high %v608_v9, %v612_v10  ;;  %v615_v15 = vld [vmem:[%s2195_s11 + $0x200] sm:$0xff]  ;;  %v616_v17 = vld [vmem:[%s2195_s11 + $0x208] sm:$0xff]  ;;  %v1689_v19 = vcombine.low %v607_v6, %v611_v8  ;;  %v1691_v20 = vcombine.low %v608_v9, %v612_v10 }
  0x69   : > { %1326 = vmatpush1.bf16.msra.mxu0 %v1657_v46  ;;  %1367 = vmatpush1.bf16.msra.mxu1 %v1659_v47  ;;  %v619_v16 = vld [vmem:[%s2195_s11 + $0x220] sm:$0xff]  ;;  %v620_v18 = vld [vmem:[%s2195_s11 + $0x228] sm:$0xff]  ;;  %v531_v10 = vmul.f32 %v524_v3, %v517_v61 }
  0x6a   : > { %1327 = vmatprep.subr.bf16.mxu0 %v1666_v48  ;;  %1368 = vmatprep.subr.bf16.mxu1 %v1668_v50  ;;  %v1698_v21 = vcombine.high %v615_v15, %v619_v16  ;;  %v1700_v22 = vcombine.high %v616_v17, %v620_v18  ;;  %v623_v23 = vld [vmem:[%s2195_s11 + $0x240] sm:$0xff]  ;;  %v624_v25 = vld [vmem:[%s2195_s11 + $0x248] sm:$0xff]  ;;  %v1697_v27 = vcombine.low %v615_v15, %v619_v16 }
  0x6b   : > { %v627_v24 = vld [vmem:[%s2195_s11 + $0x260] sm:$0xff]  ;;  %v628_v26 = vld [vmem:[%s2195_s11 + $0x268] sm:$0xff]  ;;  %v1699_v28 = vcombine.low %v616_v17, %v620_v18  ;;  %v545_v18 = vadd.f32 %v538_v1, %v531_v10  ;;  %v601_v1 = vld [vmem:[%s2195_s11 + $0x190] sm:$0xff] }
  0x6c   : > { %v1706_v29 = vcombine.high %v623_v23, %v627_v24  ;;  %v1708_v30 = vcombine.high %v624_v25, %v628_v26  ;;  %v631_v31 = vld [vmem:[%s2195_s11 + $0x280] sm:$0xff]  ;;  %v632_v33 = vld [vmem:[%s2195_s11 + $0x288] sm:$0xff]  ;;  %v1705_v35 = vcombine.low %v623_v23, %v627_v24  ;;  %v1707_v36 = vcombine.low %v624_v25, %v628_v26  ;;  %v557_v23 = vld [vmem:[%s2195_s11 + $0x30] sm:$0xff] }
  0x6d   : > { %1328 = vmatpush1.bf16.msra.mxu0 %v1665_v55  ;;  %1369 = vmatpush1.bf16.msra.mxu1 %v1667_v56  ;;  %v635_v32 = vld [vmem:[%s2195_s11 + $0x2a0] sm:$0xff]  ;;  %v636_v34 = vld [vmem:[%s2195_s11 + $0x2a8] sm:$0xff]  ;;  %v547_v24 = vmax.f32 %v545_v18, 0.0  ;;  %v554_v25 = vld [vmem:[%s2195_s11 + $0x18] sm:$0xff] }
  0x6e   : > { %1329 = vmatprep.subr.bf16.mxu0 %v1674_v57  ;;  %1370 = vmatprep.subr.bf16.mxu1 %v1676_v58  ;;  %v1714_v37 = vcombine.high %v631_v31, %v635_v32  ;;  %v1716_v38 = vcombine.high %v632_v33, %v636_v34  ;;  %v639_v39 = vld [vmem:[%s2195_s11 + $0x2c0] sm:$0xff]  ;;  %v640_v41 = vld [vmem:[%s2195_s11 + $0x2c8] sm:$0xff]  ;;  %v1713_v43 = vcombine.low %v631_v31, %v635_v32  ;;  %v558_v26 = vld [vmem:[%s2195_s11 + $0x38] sm:$0xff] }
  0x6f   : > { %v643_v40 = vld [vmem:[%s2195_s11 + $0x2e0] sm:$0xff]  ;;  %v644_v42 = vld [vmem:[%s2195_s11 + $0x2e8] sm:$0xff]  ;;  %v1715_v44 = vcombine.low %v632_v33, %v636_v34  ;;  %v561_v31 = vld [vmem:[%s2195_s11 + $0x50] sm:$0xff]  ;;  %v2284_v33 = vpack.c.bf16 %v547_v24, %v547_v24 }
  0x70   : > { %v1722_v45 = vcombine.high %v639_v39, %v643_v40  ;;  %v1724_v46 = vcombine.high %v640_v41, %v644_v42  ;;  %v647_v47 = vld [vmem:[%s2195_s11 + $0x300] sm:$0xff]  ;;  %v648_v50 = vld [vmem:[%s2195_s11 + $0x308] sm:$0xff]  ;;  %v1721_v53 = vcombine.low %v639_v39, %v643_v40  ;;  %v1723_v54 = vcombine.low %v640_v41, %v644_v42  ;;  %v565_v32 = vld [vmem:[%s2195_s11 + $0x70] sm:$0xff] }
  0x71   : > { %1330 = vmatpush1.bf16.msra.mxu0 %v1673_v63  ;;  %1371 = vmatpush1.bf16.msra.mxu1 %v1675_v0  ;;  %v651_v48 = vld [vmem:[%s2195_s11 + $0x320] sm:$0xff]  ;;  %v652_v51 = vld [vmem:[%s2195_s11 + $0x328] sm:$0xff]  ;;  %v562_v34 = vld [vmem:[%s2195_s11 + $0x58] sm:$0xff] }
  0x72   : > { %1331 = vmatprep.subr.bf16.mxu0 %v1682_v4  ;;  %1372 = vmatprep.subr.bf16.mxu1 %v1684_v5  ;;  %v1730_v55 = vcombine.high %v647_v47, %v651_v48  ;;  %v1732_v56 = vcombine.high %v648_v50, %v652_v51  ;;  %v655_v57 = vld [vmem:[%s2195_s11 + $0x340] sm:$0xff]  ;;  %v656_v59 = vld [vmem:[%s2195_s11 + $0x348] sm:$0xff]  ;;  %v1729_v62 = vcombine.low %v647_v47, %v651_v48  ;;  %v569_v40 = vld [vmem:[%s2195_s11 + $0x90] sm:$0xff] }
  0x73   : > { %v659_v58 = vld [vmem:[%s2195_s11 + $0x360] sm:$0xff]  ;;  %v660_v60 = vld [vmem:[%s2195_s11 + $0x368] sm:$0xff]  ;;  %v1731_v63 = vcombine.low %v648_v50, %v652_v51  ;;  %v573_v41 = vld [vmem:[%s2195_s11 + $0xb0] sm:$0xff] }
  0x74   : > { %v1738_v0 = vcombine.high %v655_v57, %v659_v58  ;;  %v1740_v4 = vcombine.high %v656_v59, %v660_v60  ;;  %v663_v5 = vld [vmem:[%s2195_s11 + $0x380] sm:$0xff]  ;;  %v664_v8 = vld [vmem:[%s2195_s11 + $0x388] sm:$0xff]  ;;  %v1737_v2 = vcombine.low %v655_v57, %v659_v58  ;;  %v570_v42 = vld [vmem:[%s2195_s11 + $0x98] sm:$0xff] }
  0x75   : > { %1332 = vmatpush1.bf16.msra.mxu0 %v1681_v11  ;;  %1373 = vmatpush1.bf16.msra.mxu1 %v1683_v12  ;;  %v667_v6 = vld [vmem:[%s2195_s11 + $0x3a0] sm:$0xff]  ;;  %v668_v9 = vld [vmem:[%s2195_s11 + $0x3a8] sm:$0xff]  ;;  %v1739_v11 = vcombine.low %v656_v59, %v660_v60  ;;  %v577_v48 = vld [vmem:[%s2195_s11 + $0xd0] sm:$0xff] }
  0x76   : > { %1333 = vmatprep.subr.bf16.mxu0 %v1690_v13  ;;  %1374 = vmatprep.subr.bf16.mxu1 %v1692_v14  ;;  %v1746_v12 = vcombine.high %v663_v5, %v667_v6  ;;  %v1748_v13 = vcombine.high %v664_v8, %v668_v9  ;;  %v671_v14 = vld [vmem:[%s2195_s11 + $0x3c0] sm:$0xff]  ;;  %v672_v16 = vld [vmem:[%s2195_s11 + $0x3c8] sm:$0xff]  ;;  %v1747_v7 = vcombine.low %v664_v8, %v668_v9  ;;  %v581_v50 = vld [vmem:[%s2195_s11 + $0xf0] sm:$0xff] }
  0x77   : > { %v675_v15 = vld [vmem:[%s2195_s11 + $0x3e0] sm:$0xff]  ;;  %v676_v17 = vld [vmem:[%s2195_s11 + $0x3e8] sm:$0xff]  ;;  %v578_v51 = vld [vmem:[%s2195_s11 + $0xd8] sm:$0xff]  ;;  %v1661_v61 = vcombine.low %v577_v48, %v581_v50 }
  0x78   : > { %v585_v57 = vld [vmem:[%s2195_s11 + $0x110] sm:$0xff]  ;;  %v586_v59 = vld [vmem:[%s2195_s11 + $0x118] sm:$0xff] }
  0x79   : > { %1334 = vmatpush1.bf16.msra.mxu0 %v1689_v19  ;;  %1375 = vmatpush1.bf16.msra.mxu1 %v1691_v20  ;;  %v1745_v19 = vcombine.low %v663_v5, %v667_v6  ;;  %v1754_v20 = vcombine.high %v671_v14, %v675_v15  ;;  %v589_v58 = vld [vmem:[%s2195_s11 + $0x130] sm:$0xff]  ;;  %v590_v60 = vld [vmem:[%s2195_s11 + $0x138] sm:$0xff] }
  0x7a   : > { %1335 = vmatprep.subr.bf16.mxu0 %v1698_v21  ;;  %1376 = vmatprep.subr.bf16.mxu1 %v1700_v22  ;;  %v1756_v21 = vcombine.high %v672_v16, %v676_v17  ;;  %v553_v22 = vld [vmem:[%s2195_s11 + $0x10] sm:$0xff]  ;;  %v1670_v3 = vcombine.high %v585_v57, %v589_v58  ;;  %v598_v5 = vld [vmem:[%s2195_s11 + $0x178] sm:$0xff]  ;;  %v1669_v6 = vcombine.low %v585_v57, %v589_v58 }
  0x7b   : > { %v1671_v8 = vcombine.low %v586_v59, %v590_v60  ;;  %v613_v18 = vld [vmem:[%s2195_s11 + $0x1f0] sm:$0xff] }
  0x7c   : > { %v617_v24 = vld [vmem:[%s2195_s11 + $0x210] sm:$0xff] }
  0x7d   : > { %1336 = vmatpush1.bf16.msra.mxu0 %v1697_v27  ;;  %1377 = vmatpush1.bf16.msra.mxu1 %v1699_v28  ;;  %v1753_v27 = vcombine.low %v671_v14, %v675_v15  ;;  %v1755_v28 = vcombine.low %v672_v16, %v676_v17  ;;  %v609_v17 = vld [vmem:[%s2195_s11 + $0x1d0] sm:$0xff] }
  0x7e   : > { %1337 = vmatprep.subr.bf16.mxu0 %v1706_v29  ;;  %1378 = vmatprep.subr.bf16.mxu1 %v1708_v30  ;;  %v1638_v29 = vcombine.high %v553_v22, %v557_v23  ;;  %v1640_v30 = vcombine.high %v554_v25, %v558_v26  ;;  %v649_v58 = vld [vmem:[%s2195_s11 + $0x310] sm:$0xff] }
  0x81   : > { %1338 = vmatpush1.bf16.msra.mxu0 %v1705_v35  ;;  %1379 = vmatpush1.bf16.msra.mxu1 %v1707_v36  ;;  %v566_v35 = vld [vmem:[%s2195_s11 + $0x78] sm:$0xff]  ;;  %v1637_v36 = vcombine.low %v553_v22, %v557_v23  ;;  %v1694_v22 = vcombine.high %v609_v17, %v613_v18 }
  0x82   : > { %1339 = vmatprep.subr.bf16.mxu0 %v1714_v37  ;;  %1380 = vmatprep.subr.bf16.mxu1 %v1716_v38  ;;  %v1639_v37 = vcombine.low %v554_v25, %v558_v26  ;;  %v1646_v38 = vcombine.high %v561_v31, %v565_v32  ;;  %v1648_v39 = vcombine.high %v562_v34, %v566_v35  ;;  %v621_v25 = vld [vmem:[%s2195_s11 + $0x230] sm:$0xff]  ;;  %v618_v26 = vld [vmem:[%s2195_s11 + $0x218] sm:$0xff] }
  0x85   : > { %1340 = vmatpush1.bf16.msra.mxu0 %v1713_v43  ;;  %1381 = vmatpush1.bf16.msra.mxu1 %v1715_v44  ;;  %v574_v43 = vld [vmem:[%s2195_s11 + $0xb8] sm:$0xff]  ;;  %v1645_v44 = vcombine.low %v561_v31, %v565_v32  ;;  %v625_v32 = vld [vmem:[%s2195_s11 + $0x250] sm:$0xff] }
  0x86   : > { %1341 = vmatprep.subr.bf16.mxu0 %v1722_v45  ;;  %1382 = vmatprep.subr.bf16.mxu1 %v1724_v46  ;;  %v1647_v45 = vcombine.low %v562_v34, %v566_v35  ;;  %v1654_v46 = vcombine.high %v569_v40, %v573_v41  ;;  %v1656_v47 = vcombine.high %v570_v42, %v574_v43  ;;  %v629_v34 = vld [vmem:[%s2195_s11 + $0x270] sm:$0xff]  ;;  %v626_v35 = vld [vmem:[%s2195_s11 + $0x258] sm:$0xff] }
  0x89   : > { %1342 = vmatpush1.bf16.msra.mxu0 %v1721_v53  ;;  %1383 = vmatpush1.bf16.msra.mxu1 %v1723_v54  ;;  %v1653_v53 = vcombine.low %v569_v40, %v573_v41  ;;  %v1655_v54 = vcombine.low %v570_v42, %v574_v43  ;;  %v633_v41 = vld [vmem:[%s2195_s11 + $0x290] sm:$0xff]  ;;  %v634_v43 = vld [vmem:[%s2195_s11 + $0x298] sm:$0xff] }
  0x8a   : > { %1343 = vmatprep.subr.bf16.mxu0 %v1730_v55  ;;  %1384 = vmatprep.subr.bf16.mxu1 %v1732_v56  ;;  %v1662_v55 = vcombine.high %v577_v48, %v581_v50  ;;  %v1664_v56 = vcombine.high %v578_v51, %v582_v52  ;;  %v637_v42 = vld [vmem:[%s2195_s11 + $0x2b0] sm:$0xff] }
  0x8b   : > { %v641_v50 = vld [vmem:[%s2195_s11 + $0x2d0] sm:$0xff] }
  0x8d   : > { %1344 = vmatpush1.bf16.msra.mxu0 %v1729_v62  ;;  %1385 = vmatpush1.bf16.msra.mxu1 %v1731_v63  ;;  %v1672_v62 = vcombine.high %v586_v59, %v590_v60  ;;  %v593_v63 = vld [vmem:[%s2195_s11 + $0x150] sm:$0xff]  ;;  %v650_v60 = vld [vmem:[%s2195_s11 + $0x318] sm:$0xff] }
  0x8e   : > { %1345 = vmatprep.subr.bf16.mxu0 %v1738_v0  ;;  %1386 = vmatprep.subr.bf16.mxu1 %v1740_v4  ;;  %v597_v0 = vld [vmem:[%s2195_s11 + $0x170] sm:$0xff]  ;;  %v594_v4 = vld [vmem:[%s2195_s11 + $0x158] sm:$0xff] }
  0x8f   : > { %v1678_v9 = vcombine.high %v593_v63, %v597_v0  ;;  %v1680_v10 = vcombine.high %v594_v4, %v598_v5  ;;  %v1679_v14 = vcombine.low %v594_v4, %v598_v5  ;;  %v653_v59 = vld [vmem:[%s2195_s11 + $0x330] sm:$0xff]  ;;  %v658_v5 = vld [vmem:[%s2195_s11 + $0x358] sm:$0xff] }
  0x90   : > { %v661_v4 = vld [vmem:[%s2195_s11 + $0x370] sm:$0xff] }
  0x91   : > { %1346 = vmatpush1.bf16.msra.mxu0 %v1737_v2  ;;  %1387 = vmatpush1.bf16.msra.mxu1 %v1739_v11  ;;  %v605_v2 = vld [vmem:[%s2195_s11 + $0x1b0] sm:$0xff]  ;;  %v602_v11 = vld [vmem:[%s2195_s11 + $0x198] sm:$0xff] }
  0x92   : > { %1347 = vmatprep.subr.bf16.mxu0 %v1746_v12  ;;  %1388 = vmatprep.subr.bf16.mxu1 %v1748_v13  ;;  %v606_v12 = vld [vmem:[%s2195_s11 + $0x1b8] sm:$0xff]  ;;  %v1677_v13 = vcombine.low %v593_v63, %v597_v0  ;;  %v1686_v15 = vcombine.high %v601_v1, %v605_v2  ;;  %v657_v0 = vld [vmem:[%s2195_s11 + $0x350] sm:$0xff] }
  0x93   : > { %v1688_v16 = vcombine.high %v602_v11, %v606_v12 }
  0x95   : > { %1348 = vmatpush1.bf16.msra.mxu0 %v1745_v19  ;;  %1389 = vmatpush1.bf16.msra.mxu1 %v1747_v7  ;;  %v610_v19 = vld [vmem:[%s2195_s11 + $0x1d8] sm:$0xff] }
  0x96   : > { %1349 = vmatprep.subr.bf16.mxu0 %v1754_v20  ;;  %1390 = vmatprep.subr.bf16.mxu1 %v1756_v21  ;;  %v614_v7 = vld [vmem:[%s2195_s11 + $0x1f8] sm:$0xff]  ;;  %v1685_v20 = vcombine.low %v601_v1, %v605_v2  ;;  %v1687_v21 = vcombine.low %v602_v11, %v606_v12  ;;  %v665_v2 = vld [vmem:[%s2195_s11 + $0x390] sm:$0xff] }
  0x97   : > { %v1696_v23 = vcombine.high %v610_v19, %v614_v7  ;;  %v669_v11 = vld [vmem:[%s2195_s11 + $0x3b0] sm:$0xff]  ;;  %v666_v12 = vld [vmem:[%s2195_s11 + $0x398] sm:$0xff] }
  0x99   : > { %1350 = vmatpush1.bf16.msra.mxu0 %v1753_v27  ;;  %1391 = vmatpush1.bf16.msra.mxu1 %v1755_v28  ;;  %v622_v27 = vld [vmem:[%s2195_s11 + $0x238] sm:$0xff]  ;;  %v1693_v28 = vcombine.low %v609_v17, %v613_v18  ;;  %v673_v18 = vld [vmem:[%s2195_s11 + $0x3d0] sm:$0xff] }
  0x9a   : > { %1401 = vmatprep.subr.bf16.mxu0 %v1638_v29  ;;  %1442 = vmatprep.subr.bf16.mxu1 %v1640_v30  ;;  %v1695_v29 = vcombine.low %v610_v19, %v614_v7  ;;  %v1702_v30 = vcombine.high %v617_v24, %v621_v25  ;;  %v1704_v31 = vcombine.high %v618_v26, %v622_v27  ;;  %v677_v19 = vld [vmem:[%s2195_s11 + $0x3f0] sm:$0xff]  ;;  %v674_v7 = vld [vmem:[%s2195_s11 + $0x3d8] sm:$0xff] }
  0x9c   : > { %1352 = vmatmul.mubr.bf16.vlgmr.msra.gmra.mrb[0].mxu0 %v2284_v33  ;;  %1393 = vmatmul.mubr.bf16.vlgmr.msra.gmra.mrb[0].mxu1 %v2284_v33 }
  0x9d   : > { %1402 = vmatpush1.bf16.msra.mxu0 %v1637_v36  ;;  %1443 = vmatpush1.bf16.msra.mxu1 %v1639_v37  ;;  %v630_v36 = vld [vmem:[%s2195_s11 + $0x278] sm:$0xff]  ;;  %v1701_v37 = vcombine.low %v617_v24, %v621_v25  ;;  %v1757_v25 = vcombine.low %v673_v18, %v677_v19 }
  0x9e   : > { %1403 = vmatprep.subr.bf16.mxu0 %v1646_v38  ;;  %1444 = vmatprep.subr.bf16.mxu1 %v1648_v39  ;;  %v1703_v38 = vcombine.low %v618_v26, %v622_v27  ;;  %v1710_v39 = vcombine.high %v625_v32, %v629_v34  ;;  %v1712_v40 = vcombine.high %v626_v35, %v630_v36 }
  0x9f   : > { %1433 = vmatprep.mubr.bf16.mxu0 %v2226_v49  ;;  %1474 = vmatprep.mubr.bf16.mxu1 %v2226_v49  ;;  %v1663_v49 = vcombine.low %v578_v51, %v582_v52  ;;  %v645_v51 = vld [vmem:[%s2195_s11 + $0x2f0] sm:$0xff]  ;;  %v642_v52 = vld [vmem:[%s2195_s11 + $0x2d8] sm:$0xff] }
  0xa1   : > { %1404 = vmatpush1.bf16.msra.mxu0 %v1645_v44  ;;  %1445 = vmatpush1.bf16.msra.mxu1 %v1647_v45  ;;  %v638_v44 = vld [vmem:[%s2195_s11 + $0x2b8] sm:$0xff]  ;;  %v1709_v45 = vcombine.low %v625_v32, %v629_v34 }
  0xa2   : > { %1405 = vmatprep.subr.bf16.mxu0 %v1654_v46  ;;  %1446 = vmatprep.subr.bf16.mxu1 %v1656_v47  ;;  %v1711_v46 = vcombine.low %v626_v35, %v630_v36  ;;  %v1718_v47 = vcombine.high %v633_v41, %v637_v42  ;;  %v1720_v48 = vcombine.high %v634_v43, %v638_v44 }
  0xa5   : > { %1406 = vmatpush1.bf16.msra.mxu0 %v1653_v53  ;;  %1447 = vmatpush1.bf16.msra.mxu1 %v1655_v54  ;;  %v646_v53 = vld [vmem:[%s2195_s11 + $0x2f8] sm:$0xff]  ;;  %v1717_v54 = vcombine.low %v633_v41, %v637_v42 }
  0xa6   : > { %1407 = vmatprep.subr.bf16.mxu0 %v1662_v55  ;;  %1448 = vmatprep.subr.bf16.mxu1 %v1664_v56  ;;  %v1719_v55 = vcombine.low %v634_v43, %v638_v44  ;;  %v1726_v56 = vcombine.high %v641_v50, %v645_v51  ;;  %v1728_v57 = vcombine.high %v642_v52, %v646_v53 }
  0xa9   : > { %1408 = vmatpush1.bf16.msra.mxu0 %v1661_v61  ;;  %1449 = vmatpush1.bf16.msra.mxu1 %v1663_v49  ;;  %v654_v61 = vld [vmem:[%s2195_s11 + $0x338] sm:$0xff]  ;;  %v1725_v49 = vcombine.low %v641_v50, %v645_v51 }
  0xaa   : > { %1409 = vmatprep.subr.bf16.mxu0 %v1670_v3  ;;  %1450 = vmatprep.subr.bf16.mxu1 %v1672_v62  ;;  %v1727_v3 = vcombine.low %v642_v52, %v646_v53  ;;  %v1734_v62 = vcombine.high %v649_v58, %v653_v59  ;;  %v1736_v63 = vcombine.high %v650_v60, %v654_v61 }
  0xad   : > { %1410 = vmatpush1.bf16.msra.mxu0 %v1669_v6  ;;  %1451 = vmatpush1.bf16.msra.mxu1 %v1671_v8  ;;  %v662_v6 = vld [vmem:[%s2195_s11 + $0x378] sm:$0xff]  ;;  %v1733_v8 = vcombine.low %v649_v58, %v653_v59 }
  0xae   : > { %1411 = vmatprep.subr.bf16.mxu0 %v1678_v9  ;;  %1452 = vmatprep.subr.bf16.mxu1 %v1680_v10  ;;  %v1735_v9 = vcombine.low %v650_v60, %v654_v61  ;;  %v1742_v10 = vcombine.high %v657_v0, %v661_v4  ;;  %v1744_v1 = vcombine.high %v658_v5, %v662_v6 }
  0xb1   : > { %1412 = vmatpush1.bf16.msra.mxu0 %v1677_v13  ;;  %1453 = vmatpush1.bf16.msra.mxu1 %v1679_v14  ;;  %v670_v13 = vld [vmem:[%s2195_s11 + $0x3b8] sm:$0xff]  ;;  %v1741_v14 = vcombine.low %v657_v0, %v661_v4 }
  0xb2   : > { %1413 = vmatprep.subr.bf16.mxu0 %v1686_v15  ;;  %1454 = vmatprep.subr.bf16.mxu1 %v1688_v16  ;;  %v1743_v15 = vcombine.low %v658_v5, %v662_v6  ;;  %v1750_v16 = vcombine.high %v665_v2, %v669_v11  ;;  %v1752_v17 = vcombine.high %v666_v12, %v670_v13 }
  0xb5   : > { %1414 = vmatpush1.bf16.msra.mxu0 %v1685_v20  ;;  %1455 = vmatpush1.bf16.msra.mxu1 %v1687_v21  ;;  %v678_v20 = vld [vmem:[%s2195_s11 + $0x3f8] sm:$0xff]  ;;  %v1749_v21 = vcombine.low %v665_v2, %v669_v11 }
  0xb6   : > { %1415 = vmatprep.subr.bf16.mxu0 %v1694_v22  ;;  %1456 = vmatprep.subr.bf16.mxu1 %v1696_v23  ;;  %v1751_v22 = vcombine.low %v666_v12, %v670_v13  ;;  %v1758_v23 = vcombine.high %v673_v18, %v677_v19  ;;  %v1760_v24 = vcombine.high %v674_v7, %v678_v20 }
  0xb7   : > { %v1759_v26 = vcombine.low %v674_v7, %v678_v20 }
  0xb9   : > { %1416 = vmatpush1.bf16.msra.mxu0 %v1693_v28  ;;  %1457 = vmatpush1.bf16.msra.mxu1 %v1695_v29 }
  0xba   : > { %1417 = vmatprep.subr.bf16.mxu0 %v1702_v30  ;;  %1458 = vmatprep.subr.bf16.mxu1 %v1704_v31 }
  0xbd   : > { %1418 = vmatpush1.bf16.msra.mxu0 %v1701_v37  ;;  %1459 = vmatpush1.bf16.msra.mxu1 %v1703_v38 }
  0xbe   : > { %1419 = vmatprep.subr.bf16.mxu0 %v1710_v39  ;;  %1460 = vmatprep.subr.bf16.mxu1 %v1712_v40 }
  0xc1   : > { %1420 = vmatpush1.bf16.msra.mxu0 %v1709_v45  ;;  %1461 = vmatpush1.bf16.msra.mxu1 %v1711_v46 }
  0xc2   : > { %1421 = vmatprep.subr.bf16.mxu0 %v1718_v47  ;;  %1462 = vmatprep.subr.bf16.mxu1 %v1720_v48 }
  0xc5   : > { %1422 = vmatpush1.bf16.msra.mxu0 %v1717_v54  ;;  %1463 = vmatpush1.bf16.msra.mxu1 %v1719_v55 }
  0xc6   : > { %1423 = vmatprep.subr.bf16.mxu0 %v1726_v56  ;;  %1464 = vmatprep.subr.bf16.mxu1 %v1728_v57 }
  0xc9   : > { %1424 = vmatpush1.bf16.msra.mxu0 %v1725_v49  ;;  %1465 = vmatpush1.bf16.msra.mxu1 %v1727_v3 }
  0xca   : > { %1425 = vmatprep.subr.bf16.mxu0 %v1734_v62  ;;  %1466 = vmatprep.subr.bf16.mxu1 %v1736_v63 }
  0xcd   : > { %1426 = vmatpush1.bf16.msra.mxu0 %v1733_v8  ;;  %1467 = vmatpush1.bf16.msra.mxu1 %v1735_v9 }
  0xce   : > { %1427 = vmatprep.subr.bf16.mxu0 %v1742_v10  ;;  %1468 = vmatprep.subr.bf16.mxu1 %v1744_v1 }
  0xd1   : > { %1428 = vmatpush1.bf16.msra.mxu0 %v1741_v14  ;;  %1469 = vmatpush1.bf16.msra.mxu1 %v1743_v15 }
  0xd2   : > { %1429 = vmatprep.subr.bf16.mxu0 %v1750_v16  ;;  %1470 = vmatprep.subr.bf16.mxu1 %v1752_v17 }
  0xd5   : > { %1430 = vmatpush1.bf16.msra.mxu0 %v1749_v21  ;;  %1471 = vmatpush1.bf16.msra.mxu1 %v1751_v22 }
  0xd6   : > { %1431 = vmatprep.subr.bf16.mxu0 %v1758_v23  ;;  %1472 = vmatprep.subr.bf16.mxu1 %v1760_v24 }
  0xd9   : > { %1432 = vmatpush1.bf16.msra.mxu0 %v1757_v25  ;;  %1473 = vmatpush1.bf16.msra.mxu1 %v1759_v26 }
  0xdc   : > { %1434 = vmatmul.mubr.bf16.vlgmr.msra.gmra.mrb[4].mxu0 %v2284_v33  ;;  %1475 = vmatmul.mubr.bf16.vlgmr.msra.gmra.mrb[4].mxu1 %v2284_v33 }
 0x16f   : > { %v1353_v27 = vpop.f32.mrb[0].mxu0  ;;  %v1394_v28 = vpop.f32.mrb[0].mxu1 }
 0x170   : > { %v1355_v29 = vpop.f32.mrb[1].mxu0  ;;  %v1396_v31 = vpop.f32.mrb[1].mxu1 }
 0x171   : > { %v1768_v30 = vpack.c.bf16 %v1355_v29, %v1353_v27  ;;  %v1357_v32 = vpop.f32.mrb[2].mxu0  ;;  %v1769_v34 = vpack.c.bf16 %v1396_v31, %v1394_v28  ;;  %v1398_v35 = vpop.f32.mrb[2].mxu1 }
 0x172   : > { %v1358_v36 = vpop.f32.mrb[3].mxu0  ;;  %v1399_v37 = vpop.f32.mrb[3].mxu1 }
 0x173   : > { %1515 = vst [vmem:[%s514_s24] sm:$0xff] %v1768_v30  ;;  %1516 = vst [vmem:[%s514_s24 + $0x8] sm:$0xff] %v1769_v34 }
 0x1af   : > { %v1435_v33 = vpop.f32.mrb[4].mxu0  ;;  %v1476_v38 = vpop.f32.mrb[4].mxu1 }
 0x1b0   : > { %v1437_v39 = vpop.f32.mrb[5].mxu0  ;;  %v1478_v41 = vpop.f32.mrb[5].mxu1 }
 0x1b1   : > { %v1770_v40 = vpack.c.bf16 %v1437_v39, %v1435_v33  ;;  %v1439_v42 = vpop.f32.mrb[6].mxu0  ;;  %v1771_v43 = vpack.c.bf16 %v1478_v41, %v1476_v38  ;;  %v1480_v44 = vpop.f32.mrb[6].mxu1 }
 0x1b2   : > { %v1440_v45 = vpop.f32.mrb[7].mxu0  ;;  %v1481_v46 = vpop.f32.mrb[7].mxu1 }
 0x1b3   : > { %1517 = vst [vmem:[%s514_s24 + $0x10] sm:$0xff] %v1770_v40  ;;  %1518 = vst [vmem:[%s514_s24 + $0x18] sm:$0xff] %v1771_v43 }
 0x1b4 PF: > { %s14_s19 = sadd.s32 1, %s1850_s19   ;;  %s2374_s15 = smov %s1838_s16 }
 0x1b5   : > { %p11_p10 = scmp.ge.s32.totalorder %s14_s19, 4   ;;  %s2375_s16 = smov %s1912_s23 }
 0x1b6   : > { %s2376_s17 = smov %s1846_s18  ;;  %s2377_s18 = smov %s2379_s20 }
 0x1b7   :  { %13 = sbr.rel (!%p11_p10) target bundleno = 3 (0x3), region = 97 }

// kernel: mnist_gen_forward.7
= control target key start
LH: loop header
LB: loop body
LE: loop exit
PB: predicated region body
PF: predicated region fallthrough
CT: control target
= control target key end

     0   :  { %s1030_s15 = smov 0   ;;  %s1032_s16 = smov 0   ;;  %s1193_s0 = inlined_call_operand.vmem [shape: bf16[32,128], index: 0, kind: input, shape index: {}]   ;;  %s1194_s1 = inlined_call_operand.vmem [shape: f32[1,128], index: 1, kind: input, shape index: {}]   ;;  %s1195_s2 = inlined_call_operand.vmem [shape: f32[1,128], index: 2, kind: input, shape index: {}]   ;;  %s1196_s3 = inlined_call_operand.vmem [shape: bf16[128,576], index: 3, kind: input, shape index: {}]   ;;  %s1197_s4 = inlined_call_operand.vmem [shape: bf16[32,576], index: 4, kind: output, shape index: {}]  }
   0x1   :  { %s1034_s17 = smov 0  }
   0x2 LB: > { %s26_s18 = sadd.s32 1, %s996_s16  ;;  %p800_p0 = scmp.ge.s32.totalorder %s1000_s17, 1  ;;  %s1000_s17 = sphi %s1034_s17, %s14_s17   ;;  %s996_s16 = sphi %s1032_s16, %s1199_s16   ;;  %s992_s15 = sphi %s1030_s15, %s1198_s15  }
   0x3   : > { %p28_p1 = scmp.ge.s32.totalorder %s26_s18, 2  ;;  %p188_p2 = scmp.lt.s32.totalorder %s1000_s17, 3 }
   0x5   : > { %s1201_s18 = smov (%p28_p1, %s26_s18), 0  ;;  %p189_p3 = pnand %p800_p0, %p188_p2 }
   0x6   : > { %v922_v0 = vld [vmem:[%s1196_s3 + $0x4] ss:$20 sps:$4 sm:$0xff] (!%p189_p3)   ;;  %s801_s21 = sshll.u32 (!%p189_p3), %s992_s15, 1  ;;  %v924_v1 = vld [vmem:[%s1196_s3] ss:$20 sps:$4 sm:$0xff] (!%p189_p3)   ;;  %v1002_v2 = vmov (!%p189_p3), 0  }
   0x7   : > { %192 = sbr.rel (%p189_p3) target bundleno = 289 (0x121), region = 36  ;;  %562 = vmatprep.mubr.bf16.mxu0 (!%p189_p3), %v1002_v2  ;;  %p225_p4 = scmp.lt.s32.totalorder (!%p189_p3), %s801_s21, 3  ;;  %605 = vmatprep.mubr.bf16.mxu1 (!%p189_p3), %v1002_v2  ;;  %v925_v3 = vld [vmem:[%s1196_s3 + $0x2c] ss:$20 sps:$4 sm:$0xff] (!%p189_p3)   ;;  %v927_v4 = vld [vmem:[%s1196_s3 + $0x28] ss:$20 sps:$4 sm:$0xff] (!%p189_p3)  }
   0x8   : > { %530 = vmatprep.subr.bf16.mxu0 (!%p189_p3), %v922_v0  ;;  %v928_v5 = vld [vmem:[%s1196_s3 + $0x54] ss:$20 sps:$4 sm:$0xff] (!%p189_p3)   ;;  %v930_v6 = vld [vmem:[%s1196_s3 + $0x50] ss:$20 sps:$4 sm:$0xff] (!%p189_p3)   ;;  %v933_v8 = vld [vmem:[%s1196_s3 + $0x78] ss:$20 sps:$4 sm:$0xff] (!%p189_p3)  }
   0x9   : > { %531 = vmatpush1.bf16.msra.mxu0 (!%p189_p3), %v924_v1  ;;  %v931_v7 = vld [vmem:[%s1196_s3 + $0x7c] ss:$20 sps:$4 sm:$0xff] (!%p189_p3)   ;;  %v945_v9 = vld [vmem:[%s1196_s3 + $0xc] ss:$20 sps:$4 sm:$0xff] (!%p189_p3)   ;;  %v934_v11 = vld [vmem:[%s1196_s3 + $0xa4] ss:$20 sps:$4 sm:$0xff] (!%p189_p3)  }
   0xa   : > { %532 = vmatprep.subr.bf16.mxu0 (!%p189_p3), %v925_v3  ;;  %v948_v10 = vld [vmem:[%s1196_s3 + $0x8] ss:$20 sps:$4 sm:$0xff] (!%p189_p3)   ;;  %v805_v13 = vld [vmem:[%s1194_s1] ss:$0 sm:$0xff] (!%p189_p3)  ;;  %573 = vmatprep.subr.bf16.mxu1 (!%p189_p3), %v945_v9  ;;  %v951_v17 = vld [vmem:[%s1196_s3 + $0x30] ss:$20 sps:$4 sm:$0xff] (!%p189_p3)  }
   0xb   : > { %v949_v16 = vld [vmem:[%s1196_s3 + $0x34] ss:$20 sps:$4 sm:$0xff] (!%p189_p3)   ;;  %574 = vmatpush1.bf16.msra.mxu1 (!%p189_p3), %v948_v10  ;;  %v937_v19 = vld [vmem:[%s1196_s3 + $0xcc] ss:$20 sps:$4 sm:$0xff] (!%p189_p3)   ;;  %v953_v20 = vld [vmem:[%s1196_s3 + $0x5c] ss:$20 sps:$4 sm:$0xff] (!%p189_p3)  }
   0xc   : > { %v936_v18 = vld [vmem:[%s1196_s3 + $0xa0] ss:$20 sps:$4 sm:$0xff] (!%p189_p3)   ;;  %575 = vmatprep.subr.bf16.mxu1 (!%p189_p3), %v949_v16  ;;  %v939_v21 = vld [vmem:[%s1196_s3 + $0xc8] ss:$20 sps:$4 sm:$0xff] (!%p189_p3)   ;;  %v955_v25 = vld [vmem:[%s1196_s3 + $0x58] ss:$20 sps:$4 sm:$0xff] (!%p189_p3)  }
   0xd   : > { %533 = vmatpush1.bf16.msra.mxu0 (!%p189_p3), %v927_v4  ;;  %v806_v24 = vld [vmem:[%s1195_s2] ss:$0 sm:$0xff] (!%p189_p3)  ;;  %v957_v26 = vld [vmem:[%s1196_s3 + $0x84] ss:$20 sps:$4 sm:$0xff] (!%p189_p3)   ;;  %v940_v27 = vld [vmem:[%s1196_s3 + $0xf4] ss:$20 sps:$4 sm:$0xff] (!%p189_p3)  }
   0xe   : > { %s1203_s21 = smov (!%p225_p4, %s801_s21), 3  ;;  %534 = vmatprep.subr.bf16.mxu0 %v928_v5  ;;  %v959_v30 = vld [vmem:[%s1196_s3 + $0x80] ss:$20 sps:$4 sm:$0xff]   ;;  %v942_v31 = vld [vmem:[%s1196_s3 + $0xf0] ss:$20 sps:$4 sm:$0xff]   ;;  %v1003_v43 = vmov 0.0  }
   0xf   : > { %s802_s30 = sshll.u32 %s1203_s21, 2  ;;  %576 = vmatpush1.bf16.msra.mxu1 %v951_v17  ;;  %v961_v32 = vld [vmem:[%s1196_s3 + $0xac] ss:$20 sps:$4 sm:$0xff]   ;;  %v943_v33 = vld [vmem:[%s1196_s3 + $0x11c] ss:$20 sps:$4 sm:$0xff]   ;;  %vm1004_vm0 = vmmov 0  }
  0x10   : > { %s228_s11 = scalar_lea.vmem %s1193_s0, %s802_s30  ;;  %577 = vmatprep.subr.bf16.mxu1 %v953_v20  ;;  %v947_v34 = vld [vmem:[%s1196_s3 + $0x118] ss:$20 sps:$4 sm:$0xff]   ;;  %v963_v37 = vld [vmem:[%s1196_s3 + $0xa8] ss:$20 sps:$4 sm:$0xff]   ;;  %v967_v40 = vld [vmem:[%s1196_s3 + $0xd0] ss:$20 sps:$4 sm:$0xff]  }
  0x11   : > { %535 = vmatpush1.bf16.msra.mxu0 %v930_v6  ;;  %v862_v12 = vld [vmem:[%s228_s11] sm:$0xff]   ;;  %v965_v38 = vld [vmem:[%s1196_s3 + $0xd4] ss:$20 sps:$4 sm:$0xff]   ;;  %v969_v42 = vld [vmem:[%s1196_s3 + $0xfc] ss:$20 sps:$4 sm:$0xff]   ;;  %s894_s19 = smul.u32 20, %s1203_s21 }
  0x12   : > { %536 = vmatprep.subr.bf16.mxu0 %v931_v7  ;;  %v863_v14 = vunpack.c.l.bf16 %v862_v12  ;;  %v864_v15 = vunpack.c.h.bf16 %v862_v12  ;;  %v952_v41 = vld [vmem:[%s1196_s3 + $0x10] ss:$20 sps:$4 sm:$0xff]   ;;  %v971_v44 = vld [vmem:[%s1196_s3 + $0xf8] ss:$20 sps:$4 sm:$0xff]   ;;  %v975_v47 = vld [vmem:[%s1196_s3 + $0x120] ss:$20 sps:$4 sm:$0xff]  }
  0x13   : > { %578 = vmatpush1.bf16.msra.mxu1 %v955_v25  ;;  %v956_v45 = vld [vmem:[%s1196_s3 + $0x38] ss:$20 sps:$4 sm:$0xff]   ;;  %v960_v48 = vld [vmem:[%s1196_s3 + $0x60] ss:$20 sps:$4 sm:$0xff]   ;;  %v964_v49 = vld [vmem:[%s1196_s3 + $0x88] ss:$20 sps:$4 sm:$0xff]   ;;  %s245_s23 = scalar_lea.vmem %s1197_s4, %s894_s19 }
  0x14   : > { %v260_v22 = vmul.f32 %v863_v14, %v805_v13  ;;  %v261_v23 = vmul.f32 %v864_v15, %v805_v13  ;;  %579 = vmatprep.subr.bf16.mxu1 %v957_v26  ;;  %v973_v46 = vld [vmem:[%s1196_s3 + $0x124] ss:$20 sps:$4 sm:$0xff]   ;;  %v976_v52 = vld [vmem:[%s1196_s3 + $0x100] ss:$20 sps:$4 sm:$0xff]   ;;  %v977_v53 = vld [vmem:[%s1196_s3 + $0x128] ss:$20 sps:$4 sm:$0xff]  }
  0x15   : > { %537 = vmatpush1.bf16.msra.mxu0 %v933_v8  ;;  %v968_v50 = vld [vmem:[%s1196_s3 + $0xb0] ss:$20 sps:$4 sm:$0xff]   ;;  %v972_v51 = vld [vmem:[%s1196_s3 + $0xd8] ss:$20 sps:$4 sm:$0xff]   ;;  %vm691_vm1 = vcmask 519168  }
  0x16   : > { %538 = vmatprep.subr.bf16.mxu0 %v934_v11  ;;  %v269_v28 = vadd.f32 %v806_v24, %v260_v22  ;;  %v270_v29 = vadd.f32 %v806_v24, %v261_v23 }
  0x17   : > { %580 = vmatpush1.bf16.msra.mxu1 %v959_v30 }
  0x18   : > { %v271_v35 = vmax.f32 %v269_v28, 0.0  ;;  %v272_v36 = vmax.f32 %v270_v29, 0.0  ;;  %581 = vmatprep.subr.bf16.mxu1 %v961_v32 }
  0x19   : > { %539 = vmatpush1.bf16.msra.mxu0 %v936_v18 }
  0x1a   : > { %540 = vmatprep.subr.bf16.mxu0 %v937_v19  ;;  %v273_v39 = vpack.c.bf16 %v272_v36, %v271_v35 }
  0x1b   : > { %582 = vmatpush1.bf16.msra.mxu1 %v963_v37 }
  0x1c   : > { %583 = vmatprep.subr.bf16.mxu1 %v965_v38 }
  0x1d   : > { %541 = vmatpush1.bf16.msra.mxu0 %v939_v21 }
  0x1e   : > { %542 = vmatprep.subr.bf16.mxu0 %v940_v27 }
  0x1f   : > { %584 = vmatpush1.bf16.msra.mxu1 %v967_v40 }
  0x20   : > { %585 = vmatprep.subr.bf16.mxu1 %v969_v42 }
  0x21   : > { %543 = vmatpush1.bf16.msra.mxu0 %v942_v31 }
  0x22   : > { %544 = vmatprep.subr.bf16.mxu0 %v943_v33 }
  0x23   : > { %586 = vmatpush1.bf16.msra.mxu1 %v971_v44 }
  0x24   : > { %587 = vmatprep.subr.bf16.mxu1 %v973_v46 }
  0x25   : > { %545 = vmatpush1.bf16.msra.mxu0 %v947_v34 }
  0x26   : > { %874 = vmatprep.subr.bf16.mxu0 %v1003_v43 }
  0x27   : > { %588 = vmatpush1.bf16.msra.mxu1 %v975_v47 }
  0x28   : > { %563 = vmatmul.mubr.bf16.vlgmr.msra.gmra.mrb[0].mxu0 %v273_v39 }
  0x29   : > { %875 = vmatpush3.bf16.msra.mxu0 %v952_v41  ;;  %890 = vmatprep.mubr.msk.bf16.mxu0 %vm1004_vm0, %v1003_v43 }
  0x2a   : > { %876 = vmatprep.subr.bf16.mxu0 %v1003_v43  ;;  %606 = vmatmul.mubr.bf16.vlgmr.msra.gmra.mrb[0].mxu1 %v273_v39 }
  0x2d   : > { %877 = vmatpush3.bf16.msra.mxu0 %v956_v45 }
  0x2e   : > { %878 = vmatprep.subr.bf16.mxu0 %v1003_v43 }
  0x31   : > { %879 = vmatpush3.bf16.msra.mxu0 %v960_v48 }
  0x32   : > { %880 = vmatprep.subr.bf16.mxu0 %v1003_v43 }
  0x35   : > { %881 = vmatpush3.bf16.msra.mxu0 %v964_v49 }
  0x36   : > { %882 = vmatprep.subr.bf16.mxu0 %v1003_v43 }
  0x39   : > { %883 = vmatpush3.bf16.msra.mxu0 %v968_v50 }
  0x3a   : > { %884 = vmatprep.subr.bf16.mxu0 %v1003_v43 }
  0x3d   : > { %885 = vmatpush3.bf16.msra.mxu0 %v972_v51 }
  0x3e   : > { %886 = vmatprep.subr.bf16.mxu0 %v1003_v43 }
  0x41   : > { %887 = vmatpush3.bf16.msra.mxu0 %v976_v52 }
  0x42   : > { %888 = vmatprep.subr.bf16.mxu0 %v1003_v43 }
  0x45   : > { %889 = vmatpush3.bf16.msra.mxu0 %v977_v53 }
  0x48   : > { %891 = vmatmul.mubr.bf16.vlgmr.msra.gmra.mrb[4].mxu0 %v273_v39 }
  0xfb   : > { %v564_v54 = vpop.f32.mrb[0].mxu0 }
  0xfc   : > { %v566_v55 = vpop.f32.mrb[1].mxu0 }
  0xfd   : > { %v855_v56 = vpack.c.bf16 %v566_v55, %v564_v54  ;;  %v568_v57 = vpop.f32.mrb[2].mxu0  ;;  %v607_v60 = vpop.f32.mrb[0].mxu1 }
  0xfe   : > { %v570_v58 = vpop.f32.mrb[3].mxu0  ;;  %v609_v61 = vpop.f32.mrb[1].mxu1 }
  0xff   : > { %689 = vst [vmem:[%s245_s23] sm:$0xff] %v855_v56  ;;  %v858_v59 = vpack.c.bf16 %v570_v58, %v568_v57  ;;  %v856_v62 = vpack.c.bf16 %v609_v61, %v607_v60  ;;  %v611_v63 = vpop.f32.mrb[2].mxu1 }
 0x100   : > { %v613_v0 = vpop.f32.mrb[3].mxu1 }
 0x101   : > { %693 = vst [vmem:[%s245_s23 + $0x14] sm:$0xff] %v858_v59  ;;  %690 = vst [vmem:[%s245_s23 + $0x8] sm:$0xff] %v856_v62  ;;  %v859_v1 = vpack.c.bf16 %v613_v0, %v611_v63 }
 0x103   : > { %694 = vst [vmem:[%s245_s23 + $0x1c] sm:$0xff] %v859_v1 }
 0x11b   : > { %v650_v2 = vpop.f32.mrb[4].mxu0 }
 0x11c   : > { %v857_v3 = vpack.c.bf16 %v650_v2, %v650_v2  ;;  %v892_v4 = vpop.f32.mrb[5].mxu0 }
 0x11d   : > { %v653_v5 = vpop.f32.mrb[6].mxu0 }
 0x11e   : > { %692 = vst.msk [vmem:[%s245_s23 + $0x10] sm:$0xf] %vm691_vm1, %v857_v3  ;;  %v860_v6 = vpack.c.bf16 %v653_v5, %v653_v5  ;;  %v893_v7 = vpop.f32.mrb[7].mxu0 }
 0x120   : > { %695 = vst.msk [vmem:[%s245_s23 + $0x24] sm:$0xf] %vm691_vm1, %v860_v6 }
 0x121 PF: > { %s14_s17 = sadd.s32 1, %s1000_s17   ;;  %s1198_s15 = smov %s996_s16 }
 0x122   : > { %p11_p5 = scmp.ge.s32.totalorder %s14_s17, 4   ;;  %s1199_s16 = smov %s1201_s18 }
 0x124   :  { %13 = sbr.rel (!%p11_p5) target bundleno = 2 (0x2), region = 69 }

// kernel: mnist_gen_forward.8
= control target key start
LH: loop header
LB: loop body
LE: loop exit
PB: predicated region body
PF: predicated region fallthrough
CT: control target
= control target key end

     0   :  { %s1037_s15 = smov 0   ;;  %s1039_s16 = smov 0   ;;  %s1222_s0 = inlined_call_operand.vmem [shape: bf16[104,64], index: 0, kind: input, shape index: {}]   ;;  %s1223_s1 = inlined_call_operand.vmem [shape: f32[1,64], index: 1, kind: input, shape index: {}]   ;;  %s1224_s2 = inlined_call_operand.vmem [shape: f32[1,64], index: 2, kind: input, shape index: {}]   ;;  %s1225_s3 = inlined_call_operand.vmem [shape: bf16[64,512], index: 3, kind: input, shape index: {}]   ;;  %s1226_s4 = inlined_call_operand.vmem [shape: bf16[104,512], index: 4, kind: output, shape index: {}]  }
   0x1   :  { %s1041_s17 = smov 0   ;;  %s1043_s18 = smov 0  }
   0x2   :  { %s1045_s19 = smov 0  }
   0x3 LB: > { %s23_s20 = sadd.s32 1, %s1005_s18  ;;  %s821_s21 = sadd.s32 4294967295, %s1009_s19   ;;  %s1009_s19 = sphi %s1045_s19, %s14_s19   ;;  %s1005_s18 = sphi %s1043_s18, %s1231_s18   ;;  %s1001_s17 = sphi %s1041_s17, %s1230_s17   ;;  %s997_s16 = sphi %s1039_s16, %s1229_s16   ;;  %s993_s15 = sphi %s1037_s15, %s1228_s15  }
   0x4   : > { %p24_p0 = scmp.ge.s32.totalorder %s23_s20, 2  ;;  %p108_p1 = scmp.ne.s32.totalorder %s997_s16, %s993_s15 }
   0x5   : > { %p109_p2 = scmp.eq.s32.totalorder %s1009_s19, 0  ;;  %p140_p4 = scmp.eq.s32.totalorder %s821_s21, 1 }
   0x6   : > { %s1233_s20 = smov (%p24_p0, %s23_s20), 0  ;;  %s101_s23 = sadd.s32 1, %s997_s16 }
   0x7   : > { %p110_p3 = por %p109_p2, %p108_p1  ;;  %s98_s22 = ssub.s32 %s1005_s18, %s1233_s20 }
   0x8   : > { %p99_p5 = scmp.eq.s32.totalorder %s98_s22, 0  ;;  %p1072_p6 = por %p140_p4, %p108_p1 }
   0x9   : > { %p825_p7 = scmp.ge.s32.totalorder %s1009_s19, 2 }
   0xa   : > { %s1077_s25 = scalar_select %p99_p5, %s997_s16, %s101_s23  }
   0xb   : > { %177 = sbr.rel (%p825_p7) target bundleno = 26 (0x1a), region = 28 }
  0x12   : > { %180 = sbr.rel (!%p110_p3) target bundleno = 26 (0x1a), region = 32  ;;  %s182_s26 = sand.u32 (%p110_p3), 1, %s997_s16  }
  0x13   : > { %s865_s27 = sshll.u32 (%p110_p3), %s1005_s18, 3  ;;  %s826_s28 = sshll.u32 (%p110_p3), %s182_s26, 6 }
  0x14   : > { %s187_s5 = scalar_lea.vmem (%p110_p3), %s1225_s3, %s865_s27  ;;  %s184_s6 = scalar_lea.vmem (%p110_p3), [#allocation2], %s826_s28 }
  0x15   : > { %v229_v0 = vld [vmem:[%s187_s5] sm:$0xff] (%p110_p3)  ;;  %v231_v1 = vld [vmem:[%s187_s5 + $0x10] sm:$0xff] (%p110_p3) }
  0x16   : > { %v233_v2 = vld [vmem:[%s187_s5 + $0x20] sm:$0xff] (%p110_p3)  ;;  %230 = vst [vmem:[%s184_s6] sm:$0xff] (%p110_p3), %v229_v0  ;;  %232 = vst [vmem:[%s184_s6 + $0x8] sm:$0xff] (%p110_p3), %v231_v1  ;;  %v235_v3 = vld [vmem:[%s187_s5 + $0x30] sm:$0xff] (%p110_p3) }
  0x17   : > { %234 = vst [vmem:[%s184_s6 + $0x10] sm:$0xff] (%p110_p3), %v233_v2  ;;  %v237_v4 = vld [vmem:[%s187_s5 + $0x40] sm:$0xff] (%p110_p3)  ;;  %v239_v5 = vld [vmem:[%s187_s5 + $0x50] sm:$0xff] (%p110_p3)  ;;  %236 = vst [vmem:[%s184_s6 + $0x18] sm:$0xff] (%p110_p3), %v235_v3 }
  0x18   : > { %238 = vst [vmem:[%s184_s6 + $0x20] sm:$0xff] (%p110_p3), %v237_v4  ;;  %240 = vst [vmem:[%s184_s6 + $0x28] sm:$0xff] (%p110_p3), %v239_v5  ;;  %v241_v6 = vld [vmem:[%s187_s5 + $0x60] sm:$0xff] (%p110_p3)  ;;  %v243_v7 = vld [vmem:[%s187_s5 + $0x70] sm:$0xff] (%p110_p3) }
  0x19   : > { %242 = vst [vmem:[%s184_s6 + $0x30] sm:$0xff] %v241_v6  ;;  %244 = vst [vmem:[%s184_s6 + $0x38] sm:$0xff] %v243_v7 }
  0x1a PF: > { %p829_p8 = scmp.ge.s32.totalorder %s1009_s19, 1  ;;  %p249_p9 = scmp.lt.s32.totalorder %s1009_s19, 3 }
  0x1c   : > { %p250_p10 = pnand %p829_p8, %p249_p9 }
  0x1d   : > { %s256_s7 = sand.u32 (!%p250_p10), 1, %s993_s15   ;;  %v881_v8 = vld [vmem:[%s1222_s0] sm:$0xff] (!%p250_p10)   ;;  %v1011_v9 = vmov (!%p250_p10), 0   ;;  %v904_v18 = vld [vmem:[%s1222_s0 + $0x8] sm:$0xff] (!%p250_p10)   ;;  %v905_v42 = vld [vmem:[%s1222_s0 + $0x10] sm:$0xff] (!%p250_p10)   ;;  %vm429_vm0 = vcmask (!%p250_p10), 523264  }
  0x1e   : > { %253 = sbr.rel (%p250_p10) target bundleno = 299 (0x12b), region = 70  ;;  %s830_s10 = sshll.u32 (!%p250_p10), %s256_s7, 6  ;;  %483 = vmatprep.mubr.bf16.mxu0 (!%p250_p10), %v1011_v9  ;;  %v882_v10 = vunpack.c.l.bf16 (!%p250_p10), %v881_v8  ;;  %v883_v11 = vunpack.c.h.bf16 (!%p250_p10), %v881_v8  ;;  %v1097_v12 = vld [vmem:[%s1223_s1] ss:$0 sm:$0xff] (!%p250_p10)  ;;  %523 = vmatprep.mubr.bf16.mxu1 (!%p250_p10), %v1011_v9  ;;  %v908_v25 = vld [vmem:[%s1222_s0 + $0x28] sm:$0xff] (!%p250_p10)   ;;  %v886_v29 = vunpack.c.l.bf16 (!%p250_p10), %v904_v18  ;;  %v887_v30 = vunpack.c.h.bf16 (!%p250_p10), %v904_v18  ;;  %v906_v1 = vld [vmem:[%s1222_s0 + $0x18] sm:$0xff] (!%p250_p10)  }
  0x1f   : > { %v907_v13 = vld [vmem:[%s1222_s0 + $0x20] sm:$0xff] (!%p250_p10)   ;;  %s1103_s21 = scalar_lea.vmem (!%p250_p10), [#allocation2], %s830_s10  ;;  %v902_v31 = vunpack.c.l.bf16 (!%p250_p10), %v908_v25  ;;  %v903_v35 = vunpack.c.h.bf16 (!%p250_p10), %v908_v25  ;;  %v307_v48 = vld [vmem:[%s1222_s0 + $0x30] sm:$0xf] (!%p250_p10)  ;;  %v890_v49 = vunpack.c.l.bf16 (!%p250_p10), %v905_v42  ;;  %v891_v53 = vunpack.c.h.bf16 (!%p250_p10), %v905_v42  ;;  %s917_s11 = smul.u32 (!%p250_p10), 104, %s256_s7 }
  0x20   : > { %v898_v14 = vunpack.c.l.bf16 (!%p250_p10), %v907_v13  ;;  %v899_v15 = vunpack.c.h.bf16 (!%p250_p10), %v907_v13  ;;  %v959_v16 = vld [vmem:[%s1103_s21 + $0x4] ss:$8 sps:$4 sm:$0xff] (!%p250_p10)   ;;  %v1109_v17 = vld [vmem:[%s1224_s2] ss:$0 sm:$0xff] (!%p250_p10)  ;;  %v328_v20 = vmul.f32 (!%p250_p10), %v882_v10, %v1097_v12  ;;  %v962_v21 = vld [vmem:[%s1103_s21 + $0x14] ss:$8 sps:$4 sm:$0xff] (!%p250_p10)   ;;  %v329_v22 = vmul.f32 (!%p250_p10), %v883_v11, %v1097_v12 }
  0x21   : > { %v961_v19 = vld [vmem:[%s1103_s21] ss:$8 sps:$4 sm:$0xff] (!%p250_p10)   ;;  %451 = vmatprep.subr.bf16.mxu0 (!%p250_p10), %v959_v16  ;;  %909 = vmatprep.subr.bf16.mxu1 (!%p250_p10), %v959_v16  ;;  %v964_v26 = vld [vmem:[%s1103_s21 + $0x10] ss:$8 sps:$4 sm:$0xff] (!%p250_p10)   ;;  %v965_v27 = vld [vmem:[%s1103_s21 + $0x24] ss:$8 sps:$4 sm:$0xff] (!%p250_p10)   ;;  %v330_v39 = vmul.f32 (!%p250_p10), %v886_v29, %v1097_v12  ;;  %v331_v40 = vmul.f32 (!%p250_p10), %v887_v30, %v1097_v12  ;;  %v338_v41 = vmul.f32 (!%p250_p10), %v902_v31, %v1097_v12  ;;  %v320_v57 = vunpack.c.l.bf16 (!%p250_p10), %v307_v48 }
  0x22   : > { %v336_v23 = vmul.f32 (!%p250_p10), %v898_v14, %v1097_v12  ;;  %v337_v24 = vmul.f32 (!%p250_p10), %v899_v15, %v1097_v12  ;;  %452 = vmatpush1.bf16.msra.mxu0 (!%p250_p10), %v961_v19  ;;  %913 = vmatpush1.bf16.msra.mxu1 (!%p250_p10), %v961_v19  ;;  %v348_v28 = vadd.f32 (!%p250_p10), %v1109_v17, %v328_v20  ;;  %v967_v36 = vld [vmem:[%s1103_s21 + $0x20] ss:$8 sps:$4 sm:$0xff] (!%p250_p10)   ;;  %v968_v37 = vld [vmem:[%s1103_s21 + $0x34] ss:$8 sps:$4 sm:$0xff] (!%p250_p10)   ;;  %v970_v47 = vld [vmem:[%s1103_s21 + $0x30] ss:$8 sps:$4 sm:$0xff] (!%p250_p10)   ;;  %v894_v4 = vunpack.c.l.bf16 (!%p250_p10), %v906_v1 }
  0x23   : > { %453 = vmatprep.subr.bf16.mxu0 (!%p250_p10), %v962_v21  ;;  %910 = vmatprep.subr.bf16.mxu1 (!%p250_p10), %v962_v21  ;;  %v349_v32 = vadd.f32 (!%p250_p10), %v1109_v17, %v329_v22  ;;  %v339_v46 = vmul.f32 (!%p250_p10), %v903_v35, %v1097_v12  ;;  %v350_v50 = vadd.f32 (!%p250_p10), %v1109_v17, %v330_v39  ;;  %v895_v8 = vunpack.c.h.bf16 (!%p250_p10), %v906_v1  ;;  %s1173_s12 = scalar_lea.vmem (!%p250_p10), [#allocation3], %s917_s11 }
  0x24   : > { %v356_v33 = vadd.f32 (!%p250_p10), %v1109_v17, %v336_v23  ;;  %v357_v34 = vadd.f32 (!%p250_p10), %v1109_v17, %v337_v24  ;;  %v361_v38 = vmax.f32 (!%p250_p10), %v348_v28, 0.0  ;;  %v351_v51 = vadd.f32 (!%p250_p10), %v1109_v17, %v331_v40 }
  0x25   : > { %v362_v43 = vmax.f32 %v349_v32, 0.0  ;;  %v358_v52 = vadd.f32 %v1109_v17, %v338_v41  ;;  %v359_v56 = vadd.f32 %v1109_v17, %v339_v46  ;;  %v363_v58 = vmax.f32 %v350_v50, 0.0  ;;  %s879_s15 = sshll.u32 (%p1072_p6), %s1001_s17, 3 }
  0x26   : > { %454 = vmatpush1.bf16.msra.mxu0 %v964_v26  ;;  %914 = vmatpush1.bf16.msra.mxu1 %v964_v26  ;;  %v369_v44 = vmax.f32 %v356_v33, 0.0  ;;  %v370_v45 = vmax.f32 %v357_v34, 0.0  ;;  %v364_v59 = vmax.f32 %v351_v51, 0.0  ;;  %v332_v60 = vmul.f32 %v890_v49, %v1097_v12  ;;  %s657_s14 = scalar_lea.vmem (%p1072_p6), %s1226_s4, %s879_s15 }
  0x27   : > { %455 = vmatprep.subr.bf16.mxu0 %v965_v27  ;;  %911 = vmatprep.subr.bf16.mxu1 %v965_v27  ;;  %v374_v54 = vpack.c.bf16 %v362_v43, %v361_v38  ;;  %v371_v61 = vmax.f32 %v358_v52, 0.0  ;;  %v372_v62 = vmax.f32 %v359_v56, 0.0  ;;  %v333_v63 = vmul.f32 %v891_v53, %v1097_v12 }
  0x28   : > { %v378_v55 = vpack.c.bf16 %v370_v45, %v369_v44  ;;  %v340_v0 = vmul.f32 %v1097_v12, %v320_v57  ;;  %v375_v2 = vpack.c.bf16 %v364_v59, %v363_v58  ;;  %v352_v3 = vadd.f32 %v1109_v17, %v332_v60 }
  0x29   : > { %v379_v5 = vpack.c.bf16 %v372_v62, %v371_v61  ;;  %v353_v6 = vadd.f32 %v1109_v17, %v333_v63  ;;  %v334_v14 = vmul.f32 %v894_v4, %v1097_v12  ;;  %v335_v15 = vmul.f32 %v895_v8, %v1097_v12 }
  0x2a   : > { %456 = vmatpush1.bf16.msra.mxu0 %v967_v36  ;;  %915 = vmatpush1.bf16.msra.mxu1 %v967_v36  ;;  %v360_v7 = vadd.f32 %v1109_v17, %v340_v0  ;;  %v365_v10 = vmax.f32 %v352_v3, 0.0 }
  0x2b   : > { %457 = vmatprep.subr.bf16.mxu0 %v968_v37  ;;  %912 = vmatprep.subr.bf16.mxu1 %v968_v37  ;;  %v366_v11 = vmax.f32 %v353_v6, 0.0  ;;  %v354_v19 = vadd.f32 %v1109_v17, %v334_v14  ;;  %v355_v20 = vadd.f32 %v1109_v17, %v335_v15 }
  0x2c   : > { %v373_v13 = vmax.f32 %v360_v7, 0.0 }
  0x2d   : > { %v376_v16 = vpack.c.bf16 %v366_v11, %v365_v10  ;;  %v367_v21 = vmax.f32 %v354_v19, 0.0  ;;  %v368_v22 = vmax.f32 %v355_v20, 0.0 }
  0x2e   : > { %458 = vmatpush1.bf16.msra.mxu0 %v970_v47  ;;  %916 = vmatpush1.bf16.msra.mxu1 %v970_v47  ;;  %v380_v18 = vpack.c.bf16 %v373_v13, %v373_v13 }
  0x2f   : > { %v377_v23 = vpack.c.bf16 %v368_v22, %v367_v21 }
  0x31   : > { %841 = vmatmul.mubr.msk.bf16.vlgmr.msra.gmra.mrb[0].mxu0 %vm429_vm0, %v374_v54  ;;  %845 = vmatmul.mubr.msk.bf16.vlgmr.msra.gmra.mrb[0].mxu1 %vm429_vm0, %v378_v55 }
  0x32   : > { %493 = vmatprep.mubr.bf16.mxu0 %v1011_v9  ;;  %533 = vmatprep.mubr.bf16.mxu1 %v1011_v9 }
  0x39   : > { %842 = vmatmul.mubr.msk.bf16.gmra.mrb[4].mxu0 %vm429_vm0, %v375_v2  ;;  %846 = vmatmul.mubr.msk.bf16.gmra.mrb[4].mxu1 %vm429_vm0, %v379_v5 }
  0x3a   : > { %503 = vmatprep.mubr.bf16.mxu0 %v1011_v9  ;;  %543 = vmatprep.mubr.bf16.mxu1 %v1011_v9 }
  0x41   : > { %843 = vmatmul.mubr.msk.bf16.gmra.mrb[8].mxu0 %vm429_vm0, %v376_v16  ;;  %847 = vmatmul.mubr.msk.bf16.gmra.mrb[8].mxu1 %vm429_vm0, %v380_v18 }
  0x42   : > { %513 = vmatprep.mubr.bf16.mxu0 %v1011_v9 }
  0x49   : > { %844 = vmatmul.mubr.msk.bf16.gmra.mrb[12].mxu0 %vm429_vm0, %v377_v23 }
 0x104   : > { %v485_v12 = vpop.f32.mrb[0].mxu0  ;;  %v525_v24 = vpop.f32.mrb[0].mxu1 }
 0x105   : > { %v487_v25 = vpop.f32.mrb[1].mxu0  ;;  %v527_v26 = vpop.f32.mrb[1].mxu1 }
 0x106   : > { %v866_v27 = vpack.c.bf16 %v487_v25, %v485_v12  ;;  %v489_v28 = vpop.f32.mrb[2].mxu0  ;;  %v874_v17 = vpack.c.bf16 %v527_v26, %v525_v24  ;;  %v529_v29 = vpop.f32.mrb[2].mxu1 }
 0x107   : > { %v491_v30 = vpop.f32.mrb[3].mxu0  ;;  %v531_v31 = vpop.f32.mrb[3].mxu1 }
 0x108   : > { %632 = vst [vmem:[%s1173_s12] sm:$0xff] %v866_v27  ;;  %v867_v9 = vpack.c.bf16 %v491_v30, %v489_v28  ;;  %640 = vst [vmem:[%s1173_s12 + $0x40] sm:$0xff] %v874_v17  ;;  %v875_v32 = vpack.c.bf16 %v531_v31, %v529_v29 }
 0x10a   : > { %633 = vst [vmem:[%s1173_s12 + $0x8] sm:$0xff] %v867_v9  ;;  %641 = vst [vmem:[%s1173_s12 + $0x48] sm:$0xff] %v875_v32 }
 0x10c   : > { %v495_v33 = vpop.f32.mrb[4].mxu0  ;;  %v535_v34 = vpop.f32.mrb[4].mxu1 }
 0x10d   : > { %v497_v35 = vpop.f32.mrb[5].mxu0  ;;  %v537_v36 = vpop.f32.mrb[5].mxu1 }
 0x10e   : > { %v868_v37 = vpack.c.bf16 %v497_v35, %v495_v33  ;;  %v499_v38 = vpop.f32.mrb[6].mxu0  ;;  %v876_v39 = vpack.c.bf16 %v537_v36, %v535_v34  ;;  %v539_v40 = vpop.f32.mrb[6].mxu1 }
 0x10f   : > { %v501_v41 = vpop.f32.mrb[7].mxu0  ;;  %v541_v42 = vpop.f32.mrb[7].mxu1  ;;  %v709_v62 = vld [vmem:[%s1173_s12] sm:$0xff] (%p1072_p6) }
 0x110   : > { %634 = vst [vmem:[%s1173_s12 + $0x10] sm:$0xff] %v868_v37  ;;  %v869_v43 = vpack.c.bf16 %v501_v41, %v499_v38  ;;  %642 = vst [vmem:[%s1173_s12 + $0x50] sm:$0xff] %v876_v39  ;;  %v877_v44 = vpack.c.bf16 %v541_v42, %v539_v40  ;;  %v725_v6 = vld [vmem:[%s1173_s12 + $0x40] sm:$0xff] (%p1072_p6) }
 0x111   : > { %v711_v63 = vld [vmem:[%s1173_s12 + $0x8] sm:$0xff] (%p1072_p6)  ;;  %710 = vst [vmem:[%s657_s14] sm:$0xff] (%p1072_p6), %v709_v62  ;;  %726 = vst [vmem:[%s657_s14 + $0x80] sm:$0xff] (%p1072_p6), %v725_v6 }
 0x112   : > { %635 = vst [vmem:[%s1173_s12 + $0x18] sm:$0xff] %v869_v43  ;;  %643 = vst [vmem:[%s1173_s12 + $0x58] sm:$0xff] %v877_v44  ;;  %v727_v7 = vld [vmem:[%s1173_s12 + $0x48] sm:$0xff] (%p1072_p6) }
 0x113   : > { %712 = vst [vmem:[%s657_s14 + $0x10] sm:$0xff] (%p1072_p6), %v711_v63  ;;  %728 = vst [vmem:[%s657_s14 + $0x90] sm:$0xff] (%p1072_p6), %v727_v7 }
 0x114   : > { %v505_v45 = vpop.f32.mrb[8].mxu0  ;;  %v545_v46 = vpop.f32.mrb[8].mxu1 }
 0x115   : > { %v507_v47 = vpop.f32.mrb[9].mxu0  ;;  %v547_v48 = vpop.f32.mrb[9].mxu1 }
 0x116   : > { %v870_v49 = vpack.c.bf16 %v507_v47, %v505_v45  ;;  %v509_v50 = vpop.f32.mrb[10].mxu0  ;;  %v878_v51 = vpack.c.bf16 %v547_v48, %v545_v46  ;;  %v549_v52 = vpop.f32.mrb[10].mxu1 }
 0x117   : > { %v511_v53 = vpop.f32.mrb[11].mxu0  ;;  %v550_v54 = vpop.f32.mrb[11].mxu1  ;;  %v713_v0 = vld [vmem:[%s1173_s12 + $0x10] sm:$0xff] (%p1072_p6) }
 0x118   : > { %636 = vst [vmem:[%s1173_s12 + $0x20] sm:$0xff] %v870_v49  ;;  %v871_v55 = vpack.c.bf16 %v511_v53, %v509_v50  ;;  %644 = vst [vmem:[%s1173_s12 + $0x60] sm:$0xff] %v878_v51  ;;  %v729_v8 = vld [vmem:[%s1173_s12 + $0x50] sm:$0xff] (%p1072_p6) }
 0x119   : > { %v715_v1 = vld [vmem:[%s1173_s12 + $0x18] sm:$0xff] (%p1072_p6)  ;;  %714 = vst [vmem:[%s657_s14 + $0x20] sm:$0xff] (%p1072_p6), %v713_v0  ;;  %730 = vst [vmem:[%s657_s14 + $0xa0] sm:$0xff] (%p1072_p6), %v729_v8 }
 0x11a   : > { %637 = vst [vmem:[%s1173_s12 + $0x28] sm:$0xff] %v871_v55  ;;  %716 = vst [vmem:[%s657_s14 + $0x30] sm:$0xff] (%p1072_p6), %v715_v1  ;;  %v731_v10 = vld [vmem:[%s1173_s12 + $0x58] sm:$0xff] (%p1072_p6) }
 0x11b   : > { %732 = vst [vmem:[%s657_s14 + $0xb0] sm:$0xff] (%p1072_p6), %v731_v10 }
 0x11c   : > { %v515_v56 = vpop.f32.mrb[12].mxu0  ;;  %651 = sbr.rel (!%p1072_p6) target bundleno = 299 (0x12b), region = 78 }
 0x11d   : > { %v517_v57 = vpop.f32.mrb[13].mxu0 }
 0x11e   : > { %v872_v58 = vpack.c.bf16 %v517_v57, %v515_v56  ;;  %v519_v59 = vpop.f32.mrb[14].mxu0 }
 0x11f   : > { %v521_v60 = vpop.f32.mrb[15].mxu0  ;;  %v717_v2 = vld [vmem:[%s1173_s12 + $0x20] sm:$0xff] (%p1072_p6) }
 0x120   : > { %638 = vst [vmem:[%s1173_s12 + $0x30] sm:$0xff] %v872_v58  ;;  %v873_v61 = vpack.c.bf16 %v521_v60, %v519_v59  ;;  %718 = vst [vmem:[%s657_s14 + $0x40] sm:$0xff] (%p1072_p6), %v717_v2  ;;  %v733_v11 = vld [vmem:[%s1173_s12 + $0x60] sm:$0xff] (%p1072_p6) }
 0x121   : > { %v719_v3 = vld [vmem:[%s1173_s12 + $0x28] sm:$0xff] (%p1072_p6)  ;;  %734 = vst [vmem:[%s657_s14 + $0xc0] sm:$0xff] (%p1072_p6), %v733_v11 }
 0x122   : > { %639 = vst [vmem:[%s1173_s12 + $0x38] sm:$0xff] %v873_v61  ;;  %720 = vst [vmem:[%s657_s14 + $0x50] sm:$0xff] (%p1072_p6), %v719_v3 }
 0x127   : > { %v721_v4 = vld [vmem:[%s1173_s12 + $0x30] sm:$0xff] }
 0x128   : > { %722 = vst [vmem:[%s657_s14 + $0x60] sm:$0xff] %v721_v4 }
 0x129   : > { %v723_v5 = vld [vmem:[%s1173_s12 + $0x38] sm:$0xff] }
 0x12a   : > { %724 = vst [vmem:[%s657_s14 + $0x70] sm:$0xff] %v723_v5 }
 0x12b PF: > { %s14_s19 = sadd.s32 1, %s1009_s19   ;;  %s1228_s15 = smov %s997_s16 }
 0x12c   : > { %p11_p11 = scmp.ge.s32.totalorder %s14_s19, 4   ;;  %s1229_s16 = smov %s1077_s25 }
 0x12d   : > { %s1230_s17 = smov %s1005_s18  ;;  %s1231_s18 = smov %s1233_s20 }
 0x12e   :  { %13 = sbr.rel (!%p11_p11) target bundleno = 3 (0x3), region = 150 }

// kernel: mnist_gen_forward.9
= control target key start
LH: loop header
LB: loop body
LE: loop exit
PB: predicated region body
PF: predicated region fallthrough
CT: control target
= control target key end

     0   :  { %s1090_s15 = smov 0   ;;  %s1092_s16 = smov 0   ;;  %s1306_s0 = inlined_call_operand.vmem [shape: bf16[400,32], index: 0, kind: input, shape index: {}]   ;;  %s1307_s1 = inlined_call_operand.vmem [shape: f32[1,32], index: 1, kind: input, shape index: {}]   ;;  %s1308_s2 = inlined_call_operand.vmem [shape: f32[1,32], index: 2, kind: input, shape index: {}]   ;;  %s1309_s3 = inlined_call_operand.vmem [shape: bf16[32,16], index: 3, kind: input, shape index: {}]   ;;  %s1310_s4 = inlined_call_operand.vmem [shape: bf16[400,16], index: 4, kind: output, shape index: {}]  }
   0x1   :  { %s1094_s17 = smov 0  }
   0x2 LB: > { %s26_s18 = sadd.s32 1, %s1057_s16  ;;  %p805_p0 = scmp.ge.s32.totalorder %s1061_s17, 1  ;;  %s1061_s17 = sphi %s1094_s17, %s14_s17   ;;  %s1057_s16 = sphi %s1092_s16, %s1312_s16   ;;  %s1053_s15 = sphi %s1090_s15, %s1311_s15  }
   0x3   : > { %p28_p1 = scmp.ge.s32.totalorder %s26_s18, 2  ;;  %p186_p2 = scmp.lt.s32.totalorder %s1061_s17, 3 }
   0x5   : > { %s1314_s18 = smov (%p28_p1, %s26_s18), 0  ;;  %p187_p3 = pnand %p805_p0, %p186_p2 }
   0x6   : > { %v1037_v0 = vld [vmem:[%s1309_s3] sm:$0xff] (!%p187_p3)   ;;  %v1063_v1 = vmov (!%p187_p3), 0.0   ;;  %v1038_v2 = vld [vmem:[%s1309_s3 + $0x8] sm:$0xff] (!%p187_p3)   ;;  %vm1064_vm0 = vmmov (!%p187_p3), 0   ;;  %s219_s23 = smul.u32 (!%p187_p3), 25, %s1053_s15  ;;  %vm407_vm1 = vcmask (!%p187_p3), 261120  }
   0x7   : > { %190 = sbr.rel (%p187_p3) target bundleno = 293 (0x125), region = 36  ;;  %951 = vmatprep.subr.bf16.mxu0 (!%p187_p3), %v1063_v1  ;;  %1007 = vmatprep.subr.bf16.mxu1 (!%p187_p3), %v1063_v1  ;;  %v1135_v3 = vld [vmem:[%s1307_s1] ss:$0 sm:$0xff] (!%p187_p3)  ;;  %vm684_vm2 = vcmask (!%p187_p3), 125952  }
   0x8   : > { %952 = vmatpush3.bf16.msra.mxu0 (!%p187_p3), %v1037_v0  ;;  %955 = vmatprep.mubr.msk.bf16.mxu0 (!%p187_p3), %vm1064_vm0, %v1063_v1  ;;  %p220_p4 = scmp.lt.s32.totalorder (!%p187_p3), %s219_s23, 49  ;;  %v1144_v12 = vld [vmem:[%s1308_s2] ss:$0 sm:$0xff] (!%p187_p3) }
   0x9   : > { %953 = vmatprep.subr.bf16.mxu0 (!%p187_p3), %v1063_v1  ;;  %1009 = vmatpush3.bf16.msra.mxu1 (!%p187_p3), %v1037_v0 }
   0xa   : > { %1008 = vmatprep.subr.bf16.mxu1 (!%p187_p3), %v1063_v1  ;;  %983 = vmatprep.mubr.msk.bf16.mxu1 (!%p187_p3), %vm1064_vm0, %v1063_v1 }
   0xc   : > { %954 = vmatpush3.bf16.msra.mxu0 (!%p187_p3), %v1038_v2 }
   0xd   : > { %1010 = vmatpush3.bf16.msra.mxu1 (!%p187_p3), %v1038_v2 }
   0xe   : > { %s1316_s23 = smov (!%p220_p4, %s219_s23), 49 }
   0xf   : > { %s806_s24 = sshll.u32 %s1316_s23, 2 }
  0x10   : > { %s1130_s27 = scalar_lea.vmem %s1306_s0, %s806_s24  ;;  %s1245_s8 = scalar_lea.vmem %s1310_s4, %s806_s24 }
  0x11   : > { %v878_v4 = vld [vmem:[%s1130_s27] sm:$0xff]   ;;  %v931_v5 = vld [vmem:[%s1130_s27 + $0x38] sm:$0xff]   ;;  %v925_v6 = vld [vmem:[%s1130_s27 + $0x8] sm:$0xff]  }
  0x12   : > { %v879_v7 = vunpack.c.l.bf16 %v878_v4  ;;  %v880_v8 = vunpack.c.h.bf16 %v878_v4  ;;  %v907_v9 = vunpack.c.l.bf16 %v931_v5  ;;  %v908_v10 = vunpack.c.h.bf16 %v931_v5  ;;  %v932_v11 = vld [vmem:[%s1130_s27 + $0x40] sm:$0xff]   ;;  %v926_v33 = vld [vmem:[%s1130_s27 + $0x10] sm:$0xff]   ;;  %v933_v38 = vld [vmem:[%s1130_s27 + $0x48] sm:$0xff]  }
  0x13   : > { %v883_v13 = vunpack.c.l.bf16 %v925_v6  ;;  %v884_v14 = vunpack.c.h.bf16 %v925_v6  ;;  %v911_v15 = vunpack.c.l.bf16 %v932_v11  ;;  %v912_v16 = vunpack.c.h.bf16 %v932_v11  ;;  %v927_v47 = vld [vmem:[%s1130_s27 + $0x18] sm:$0xff]   ;;  %v934_v52 = vld [vmem:[%s1130_s27 + $0x50] sm:$0xff]   ;;  %v928_v11 = vld [vmem:[%s1130_s27 + $0x20] sm:$0xff]  }
  0x14   : > { %v296_v17 = vmul.f32 %v879_v7, %v1135_v3  ;;  %v297_v18 = vmul.f32 %v880_v8, %v1135_v3  ;;  %v310_v19 = vmul.f32 %v907_v9, %v1135_v3  ;;  %v311_v20 = vmul.f32 %v908_v10, %v1135_v3 }
  0x15   : > { %v298_v21 = vmul.f32 %v883_v13, %v1135_v3  ;;  %v299_v22 = vmul.f32 %v884_v14, %v1135_v3  ;;  %v312_v23 = vmul.f32 %v911_v15, %v1135_v3  ;;  %v313_v24 = vmul.f32 %v912_v16, %v1135_v3  ;;  %v935_v13 = vld [vmem:[%s1130_s27 + $0x58] sm:$0xff]  }
  0x16   : > { %v328_v25 = vadd.f32 %v1144_v12, %v296_v17  ;;  %v329_v26 = vadd.f32 %v1144_v12, %v297_v18  ;;  %v342_v27 = vadd.f32 %v1144_v12, %v310_v19  ;;  %v343_v28 = vadd.f32 %v1144_v12, %v311_v20 }
  0x17   : > { %v330_v29 = vadd.f32 %v1144_v12, %v298_v21  ;;  %v331_v30 = vadd.f32 %v1144_v12, %v299_v22  ;;  %v344_v31 = vadd.f32 %v1144_v12, %v312_v23  ;;  %v345_v32 = vadd.f32 %v1144_v12, %v313_v24 }
  0x18   : > { %v353_v34 = vmax.f32 %v328_v25, 0.0  ;;  %v354_v35 = vmax.f32 %v329_v26, 0.0  ;;  %v367_v36 = vmax.f32 %v342_v27, 0.0  ;;  %v368_v37 = vmax.f32 %v343_v28, 0.0 }
  0x19   : > { %v887_v41 = vunpack.c.l.bf16 %v926_v33  ;;  %v888_v42 = vunpack.c.h.bf16 %v926_v33  ;;  %v355_v43 = vmax.f32 %v330_v29, 0.0  ;;  %v356_v44 = vmax.f32 %v331_v30, 0.0  ;;  %v263_v33 = vld [vmem:[%s1130_s27 + $0x60] sm:$0xf] }
  0x1a   : > { %v378_v39 = vpack.c.bf16 %v354_v35, %v353_v34  ;;  %v385_v40 = vpack.c.bf16 %v368_v37, %v367_v36  ;;  %v915_v45 = vunpack.c.l.bf16 %v933_v38  ;;  %v916_v46 = vunpack.c.h.bf16 %v933_v38 }
  0x1b   : > { %v369_v48 = vmax.f32 %v344_v31, 0.0  ;;  %v370_v49 = vmax.f32 %v345_v32, 0.0  ;;  %v300_v50 = vmul.f32 %v887_v41, %v1135_v3  ;;  %v301_v51 = vmul.f32 %v888_v42, %v1135_v3  ;;  %v929_v32 = vld [vmem:[%s1130_s27 + $0x28] sm:$0xff]  }
  0x1c   : > { %956 = vmatmul.mubr.msk.bf16.vlgmr.msra.gmra.mrb[0].mxu0 %vm407_vm1, %v378_v39  ;;  %984 = vmatmul.mubr.msk.bf16.vlgmr.msra.gmra.mrb[0].mxu1 %vm407_vm1, %v385_v40  ;;  %v314_v53 = vmul.f32 %v915_v45, %v1135_v3  ;;  %v315_v54 = vmul.f32 %v916_v46, %v1135_v3  ;;  %v891_v55 = vunpack.c.l.bf16 %v927_v47  ;;  %v892_v56 = vunpack.c.h.bf16 %v927_v47 }
  0x1d   : > { %959 = vmatprep.mubr.msk.bf16.mxu0 %vm1064_vm0, %v1063_v1  ;;  %987 = vmatprep.mubr.msk.bf16.mxu1 %vm1064_vm0, %v1063_v1  ;;  %v332_v57 = vadd.f32 %v1144_v12, %v300_v50  ;;  %v333_v58 = vadd.f32 %v1144_v12, %v301_v51  ;;  %v919_v59 = vunpack.c.l.bf16 %v934_v52  ;;  %v920_v60 = vunpack.c.h.bf16 %v934_v52  ;;  %v930_v50 = vld [vmem:[%s1130_s27 + $0x30] sm:$0xff]  }
  0x1e   : > { %v379_v61 = vpack.c.bf16 %v356_v44, %v355_v43  ;;  %v386_v62 = vpack.c.bf16 %v370_v49, %v369_v48  ;;  %v346_v63 = vadd.f32 %v1144_v12, %v314_v53  ;;  %v347_v0 = vadd.f32 %v1144_v12, %v315_v54 }
  0x1f   : > { %v302_v2 = vmul.f32 %v891_v55, %v1135_v3  ;;  %v303_v4 = vmul.f32 %v892_v56, %v1135_v3  ;;  %v357_v5 = vmax.f32 %v332_v57, 0.0  ;;  %v358_v6 = vmax.f32 %v333_v58, 0.0 }
  0x20   : > { %v316_v7 = vmul.f32 %v919_v59, %v1135_v3  ;;  %v317_v8 = vmul.f32 %v920_v60, %v1135_v3  ;;  %v371_v9 = vmax.f32 %v346_v63, 0.0  ;;  %v372_v10 = vmax.f32 %v347_v0, 0.0 }
  0x21   : > { %v334_v14 = vadd.f32 %v1144_v12, %v302_v2  ;;  %v335_v15 = vadd.f32 %v1144_v12, %v303_v4  ;;  %v380_v16 = vpack.c.bf16 %v358_v6, %v357_v5  ;;  %v895_v19 = vunpack.c.l.bf16 %v928_v11 }
  0x22   : > { %v348_v17 = vadd.f32 %v1144_v12, %v316_v7  ;;  %v349_v18 = vadd.f32 %v1144_v12, %v317_v8  ;;  %v387_v20 = vpack.c.bf16 %v372_v10, %v371_v9  ;;  %v896_v21 = vunpack.c.h.bf16 %v928_v11 }
  0x23   : > { %v923_v22 = vunpack.c.l.bf16 %v935_v13  ;;  %v924_v23 = vunpack.c.h.bf16 %v935_v13  ;;  %v359_v24 = vmax.f32 %v334_v14, 0.0  ;;  %v360_v25 = vmax.f32 %v335_v15, 0.0 }
  0x24   : > { %960 = vmatmul.mubr.msk.bf16.gmra.mrb[4].mxu0 %vm407_vm1, %v379_v61  ;;  %988 = vmatmul.mubr.msk.bf16.gmra.mrb[4].mxu1 %vm407_vm1, %v386_v62  ;;  %v373_v26 = vmax.f32 %v348_v17, 0.0  ;;  %v374_v27 = vmax.f32 %v349_v18, 0.0  ;;  %v304_v28 = vmul.f32 %v895_v19, %v1135_v3  ;;  %v305_v29 = vmul.f32 %v896_v21, %v1135_v3 }
  0x25   : > { %963 = vmatprep.mubr.msk.bf16.mxu0 %vm1064_vm0, %v1063_v1  ;;  %991 = vmatprep.mubr.msk.bf16.mxu1 %vm1064_vm0, %v1063_v1  ;;  %v318_v30 = vmul.f32 %v923_v22, %v1135_v3  ;;  %v319_v31 = vmul.f32 %v924_v23, %v1135_v3  ;;  %v381_v34 = vpack.c.bf16 %v360_v25, %v359_v24  ;;  %v899_v37 = vunpack.c.l.bf16 %v929_v32 }
  0x26   : > { %v388_v35 = vpack.c.bf16 %v374_v27, %v373_v26  ;;  %v336_v36 = vadd.f32 %v1144_v12, %v304_v28  ;;  %v900_v38 = vunpack.c.h.bf16 %v929_v32  ;;  %v337_v39 = vadd.f32 %v1144_v12, %v305_v29 }
  0x27   : > { %v350_v40 = vadd.f32 %v1144_v12, %v318_v30  ;;  %v351_v41 = vadd.f32 %v1144_v12, %v319_v31  ;;  %v288_v42 = vunpack.c.l.bf16 %v263_v33  ;;  %v306_v44 = vmul.f32 %v899_v37, %v1135_v3 }
  0x28   : > { %v361_v43 = vmax.f32 %v336_v36, 0.0  ;;  %v307_v45 = vmul.f32 %v900_v38, %v1135_v3  ;;  %v362_v46 = vmax.f32 %v337_v39, 0.0  ;;  %v903_v53 = vunpack.c.l.bf16 %v930_v50 }
  0x29   : > { %v375_v47 = vmax.f32 %v350_v40, 0.0  ;;  %v376_v48 = vmax.f32 %v351_v41, 0.0  ;;  %v320_v49 = vmul.f32 %v1135_v3, %v288_v42  ;;  %v338_v51 = vadd.f32 %v1144_v12, %v306_v44 }
  0x2a   : > { %v339_v52 = vadd.f32 %v1144_v12, %v307_v45  ;;  %v382_v54 = vpack.c.bf16 %v362_v46, %v361_v43  ;;  %v904_v57 = vunpack.c.h.bf16 %v930_v50  ;;  %v308_v58 = vmul.f32 %v903_v53, %v1135_v3 }
  0x2b   : > { %v389_v55 = vpack.c.bf16 %v376_v48, %v375_v47  ;;  %v352_v56 = vadd.f32 %v1144_v12, %v320_v49  ;;  %v363_v59 = vmax.f32 %v338_v51, 0.0 }
  0x2c   : > { %964 = vmatmul.mubr.msk.bf16.gmra.mrb[8].mxu0 %vm407_vm1, %v380_v16  ;;  %992 = vmatmul.mubr.msk.bf16.gmra.mrb[8].mxu1 %vm407_vm1, %v387_v20  ;;  %v364_v60 = vmax.f32 %v339_v52, 0.0  ;;  %v309_v62 = vmul.f32 %v904_v57, %v1135_v3  ;;  %v340_v2 = vadd.f32 %v1144_v12, %v308_v58 }
  0x2d   : > { %967 = vmatprep.mubr.msk.bf16.mxu0 %vm1064_vm0, %v1063_v1  ;;  %995 = vmatprep.mubr.msk.bf16.mxu1 %vm1064_vm0, %v1063_v1  ;;  %v377_v61 = vmax.f32 %v352_v56, 0.0 }
  0x2e   : > { %v383_v63 = vpack.c.bf16 %v364_v60, %v363_v59  ;;  %v341_v4 = vadd.f32 %v1144_v12, %v309_v62  ;;  %v365_v5 = vmax.f32 %v340_v2, 0.0 }
  0x2f   : > { %v390_v0 = vpack.c.bf16 %v377_v61, %v377_v61 }
  0x30   : > { %v366_v6 = vmax.f32 %v341_v4, 0.0 }
  0x32   : > { %v384_v3 = vpack.c.bf16 %v366_v6, %v365_v5 }
  0x34   : > { %968 = vmatmul.mubr.msk.bf16.gmra.mrb[12].mxu0 %vm407_vm1, %v381_v34  ;;  %996 = vmatmul.mubr.msk.bf16.gmra.mrb[12].mxu1 %vm407_vm1, %v388_v35 }
  0x35   : > { %971 = vmatprep.mubr.msk.bf16.mxu0 %vm1064_vm0, %v1063_v1  ;;  %999 = vmatprep.mubr.msk.bf16.mxu1 %vm1064_vm0, %v1063_v1 }
  0x3c   : > { %972 = vmatmul.mubr.msk.bf16.gmra.mrb[16].mxu0 %vm407_vm1, %v382_v54  ;;  %1000 = vmatmul.mubr.msk.bf16.gmra.mrb[16].mxu1 %vm407_vm1, %v389_v55 }
  0x3d   : > { %975 = vmatprep.mubr.msk.bf16.mxu0 %vm1064_vm0, %v1063_v1  ;;  %1003 = vmatprep.mubr.msk.bf16.mxu1 %vm1064_vm0, %v1063_v1 }
  0x44   : > { %976 = vmatmul.mubr.msk.bf16.gmra.mrb[20].mxu0 %vm407_vm1, %v383_v63  ;;  %1004 = vmatmul.mubr.msk.bf16.gmra.mrb[20].mxu1 %vm407_vm1, %v390_v0 }
  0x45   : > { %979 = vmatprep.mubr.msk.bf16.mxu0 %vm1064_vm0, %v1063_v1 }
  0x4c   : > { %980 = vmatmul.mubr.msk.bf16.gmra.mrb[24].mxu0 %vm407_vm1, %v384_v3 }
  0xef   : > { %v481_v12 = vpop.f32.mrb[0].mxu0  ;;  %v537_v7 = vpop.f32.mrb[0].mxu1 }
  0xf0   : > { %v852_v8 = vpack.c.bf16 %v481_v12, %v481_v12  ;;  %v957_v9 = vpop.f32.mrb[1].mxu0  ;;  %v866_v10 = vpack.c.bf16 %v537_v7, %v537_v7  ;;  %v985_v1 = vpop.f32.mrb[1].mxu1 }
  0xf1   : > { %v484_v11 = vpop.f32.mrb[2].mxu0  ;;  %v540_v13 = vpop.f32.mrb[2].mxu1 }
  0xf2   : > { %685 = vst.msk [vmem:[%s1245_s8] sm:$0xf] %vm684_vm2, %v852_v8  ;;  %v853_v14 = vpack.c.bf16 %v484_v11, %v484_v11  ;;  %v958_v15 = vpop.f32.mrb[3].mxu0  ;;  %699 = vst.msk [vmem:[%s1245_s8 + $0x38] sm:$0xf] %vm684_vm2, %v866_v10  ;;  %v867_v16 = vpack.c.bf16 %v540_v13, %v540_v13  ;;  %v986_v17 = vpop.f32.mrb[3].mxu1 }
  0xf4   : > { %686 = vst.msk [vmem:[%s1245_s8 + $0x4] sm:$0xf] %vm684_vm2, %v853_v14  ;;  %700 = vst.msk [vmem:[%s1245_s8 + $0x3c] sm:$0xf] %vm684_vm2, %v867_v16 }
  0xf7   : > { %v489_v18 = vpop.f32.mrb[4].mxu0  ;;  %v545_v19 = vpop.f32.mrb[4].mxu1 }
  0xf8   : > { %v854_v20 = vpack.c.bf16 %v489_v18, %v489_v18  ;;  %v961_v21 = vpop.f32.mrb[5].mxu0  ;;  %v868_v22 = vpack.c.bf16 %v545_v19, %v545_v19  ;;  %v989_v23 = vpop.f32.mrb[5].mxu1 }
  0xf9   : > { %v492_v24 = vpop.f32.mrb[6].mxu0  ;;  %v548_v25 = vpop.f32.mrb[6].mxu1 }
  0xfa   : > { %687 = vst.msk [vmem:[%s1245_s8 + $0x8] sm:$0xf] %vm684_vm2, %v854_v20  ;;  %v855_v26 = vpack.c.bf16 %v492_v24, %v492_v24  ;;  %v962_v27 = vpop.f32.mrb[7].mxu0  ;;  %701 = vst.msk [vmem:[%s1245_s8 + $0x40] sm:$0xf] %vm684_vm2, %v868_v22  ;;  %v869_v28 = vpack.c.bf16 %v548_v25, %v548_v25  ;;  %v990_v29 = vpop.f32.mrb[7].mxu1 }
  0xfc   : > { %688 = vst.msk [vmem:[%s1245_s8 + $0xc] sm:$0xf] %vm684_vm2, %v855_v26  ;;  %702 = vst.msk [vmem:[%s1245_s8 + $0x44] sm:$0xf] %vm684_vm2, %v869_v28 }
  0xff   : > { %v497_v30 = vpop.f32.mrb[8].mxu0  ;;  %v553_v31 = vpop.f32.mrb[8].mxu1 }
 0x100   : > { %v856_v32 = vpack.c.bf16 %v497_v30, %v497_v30  ;;  %v965_v33 = vpop.f32.mrb[9].mxu0  ;;  %v870_v34 = vpack.c.bf16 %v553_v31, %v553_v31  ;;  %v993_v35 = vpop.f32.mrb[9].mxu1 }
 0x101   : > { %v500_v36 = vpop.f32.mrb[10].mxu0  ;;  %v556_v37 = vpop.f32.mrb[10].mxu1 }
 0x102   : > { %689 = vst.msk [vmem:[%s1245_s8 + $0x10] sm:$0xf] %vm684_vm2, %v856_v32  ;;  %v857_v38 = vpack.c.bf16 %v500_v36, %v500_v36  ;;  %v966_v39 = vpop.f32.mrb[11].mxu0  ;;  %703 = vst.msk [vmem:[%s1245_s8 + $0x48] sm:$0xf] %vm684_vm2, %v870_v34  ;;  %v871_v40 = vpack.c.bf16 %v556_v37, %v556_v37  ;;  %v994_v41 = vpop.f32.mrb[11].mxu1 }
 0x104   : > { %690 = vst.msk [vmem:[%s1245_s8 + $0x14] sm:$0xf] %vm684_vm2, %v857_v38  ;;  %704 = vst.msk [vmem:[%s1245_s8 + $0x4c] sm:$0xf] %vm684_vm2, %v871_v40 }
 0x107   : > { %v505_v42 = vpop.f32.mrb[12].mxu0  ;;  %v561_v43 = vpop.f32.mrb[12].mxu1 }
 0x108   : > { %v858_v44 = vpack.c.bf16 %v505_v42, %v505_v42  ;;  %v969_v45 = vpop.f32.mrb[13].mxu0  ;;  %v872_v46 = vpack.c.bf16 %v561_v43, %v561_v43  ;;  %v997_v47 = vpop.f32.mrb[13].mxu1 }
 0x109   : > { %v508_v48 = vpop.f32.mrb[14].mxu0  ;;  %v564_v49 = vpop.f32.mrb[14].mxu1 }
 0x10a   : > { %691 = vst.msk [vmem:[%s1245_s8 + $0x18] sm:$0xf] %vm684_vm2, %v858_v44  ;;  %v859_v50 = vpack.c.bf16 %v508_v48, %v508_v48  ;;  %v970_v51 = vpop.f32.mrb[15].mxu0  ;;  %705 = vst.msk [vmem:[%s1245_s8 + $0x50] sm:$0xf] %vm684_vm2, %v872_v46  ;;  %v873_v52 = vpack.c.bf16 %v564_v49, %v564_v49  ;;  %v998_v53 = vpop.f32.mrb[15].mxu1 }
 0x10c   : > { %692 = vst.msk [vmem:[%s1245_s8 + $0x1c] sm:$0xf] %vm684_vm2, %v859_v50  ;;  %706 = vst.msk [vmem:[%s1245_s8 + $0x54] sm:$0xf] %vm684_vm2, %v873_v52 }
 0x10f   : > { %v513_v54 = vpop.f32.mrb[16].mxu0  ;;  %v569_v55 = vpop.f32.mrb[16].mxu1 }
 0x110   : > { %v860_v56 = vpack.c.bf16 %v513_v54, %v513_v54  ;;  %v973_v57 = vpop.f32.mrb[17].mxu0  ;;  %v874_v58 = vpack.c.bf16 %v569_v55, %v569_v55  ;;  %v1001_v59 = vpop.f32.mrb[17].mxu1 }
 0x111   : > { %v516_v60 = vpop.f32.mrb[18].mxu0  ;;  %v572_v61 = vpop.f32.mrb[18].mxu1 }
 0x112   : > { %693 = vst.msk [vmem:[%s1245_s8 + $0x20] sm:$0xf] %vm684_vm2, %v860_v56  ;;  %v861_v62 = vpack.c.bf16 %v516_v60, %v516_v60  ;;  %v974_v63 = vpop.f32.mrb[19].mxu0  ;;  %707 = vst.msk [vmem:[%s1245_s8 + $0x58] sm:$0xf] %vm684_vm2, %v874_v58  ;;  %v875_v0 = vpack.c.bf16 %v572_v61, %v572_v61  ;;  %v1002_v2 = vpop.f32.mrb[19].mxu1 }
 0x114   : > { %694 = vst.msk [vmem:[%s1245_s8 + $0x24] sm:$0xf] %vm684_vm2, %v861_v62  ;;  %708 = vst.msk [vmem:[%s1245_s8 + $0x5c] sm:$0xf] %vm684_vm2, %v875_v0 }
 0x117   : > { %v521_v4 = vpop.f32.mrb[20].mxu0  ;;  %v577_v5 = vpop.f32.mrb[20].mxu1 }
 0x118   : > { %v862_v6 = vpack.c.bf16 %v521_v4, %v521_v4  ;;  %v977_v3 = vpop.f32.mrb[21].mxu0  ;;  %v876_v12 = vpack.c.bf16 %v577_v5, %v577_v5  ;;  %v1005_v7 = vpop.f32.mrb[21].mxu1 }
 0x119   : > { %v524_v8 = vpop.f32.mrb[22].mxu0  ;;  %v580_v9 = vpop.f32.mrb[22].mxu1 }
 0x11a   : > { %695 = vst.msk [vmem:[%s1245_s8 + $0x28] sm:$0xf] %vm684_vm2, %v862_v6  ;;  %v863_v10 = vpack.c.bf16 %v524_v8, %v524_v8  ;;  %v978_v1 = vpop.f32.mrb[23].mxu0  ;;  %709 = vst.msk [vmem:[%s1245_s8 + $0x60] sm:$0xf] %vm684_vm2, %v876_v12  ;;  %v1006_v11 = vpop.f32.mrb[23].mxu1 }
 0x11c   : > { %696 = vst.msk [vmem:[%s1245_s8 + $0x2c] sm:$0xf] %vm684_vm2, %v863_v10 }
 0x11f   : > { %v529_v13 = vpop.f32.mrb[24].mxu0 }
 0x120   : > { %v864_v14 = vpack.c.bf16 %v529_v13, %v529_v13  ;;  %v981_v15 = vpop.f32.mrb[25].mxu0 }
 0x121   : > { %v532_v16 = vpop.f32.mrb[26].mxu0 }
 0x122   : > { %697 = vst.msk [vmem:[%s1245_s8 + $0x30] sm:$0xf] %vm684_vm2, %v864_v14  ;;  %v865_v17 = vpack.c.bf16 %v532_v16, %v532_v16  ;;  %v982_v18 = vpop.f32.mrb[27].mxu0 }
 0x124   : > { %698 = vst.msk [vmem:[%s1245_s8 + $0x34] sm:$0xf] %vm684_vm2, %v865_v17 }
 0x125 PF: > { %s14_s17 = sadd.s32 1, %s1061_s17   ;;  %s1311_s15 = smov %s1057_s16 }
 0x126   : > { %p11_p5 = scmp.ge.s32.totalorder %s14_s17, 4   ;;  %s1312_s16 = smov %s1314_s18 }
 0x128   :  { %13 = sbr.rel (!%p11_p5) target bundleno = 2 (0x2), region = 69 }

</bundles_post_ra>
